<compile_context>
chip_gen: v7x
topology: tpu7x:2x2x1
jax: 0.10.0
libtpu: 0.0.40
codegen_flags: <defaults>
</compile_context>

<pallas_src>
import math

import jax
import jax.numpy as jnp
from jax.experimental import pallas as pl
from jax.experimental.pallas import tpu as pltpu

# ---- small synthetic "pretrained model" config -------------------------------
B = 2          # batch (number of labels)
S = 8          # padded sequence length (== max_length here)
H = 32         # hidden size
NH = 4         # attention heads
DH = H // NH   # head dim
F = 64         # FFN intermediate size
L = 2          # number of transformer layers
VOCAB = 64
LN_EPS = 1e-12
NEG_INF = -10000.0


# ---- shared math helpers (used both in-kernel and in the JAX reference) ------
def _layernorm(x, g, b):
    mu = jnp.mean(x, axis=-1, keepdims=True)
    var = jnp.mean((x - mu) ** 2, axis=-1, keepdims=True)
    return (x - mu) * jax.lax.rsqrt(var + LN_EPS) * g + b


def _gelu(x):
    # tanh-approximate GELU (EUP-friendly).
    # TODO(synk): HF BERT default is erf-based GELU; tanh approximation used here.
    c = math.sqrt(2.0 / math.pi)
    return 0.5 * x * (1.0 + jnp.tanh(c * (x + 0.044715 * x * x * x)))


def _mm(a_f32, w_bf16):
    """bf16 MXU matmul with f32 accumulation."""
    return jnp.dot(a_f32.astype(jnp.bfloat16), w_bf16,
                   preferred_element_type=jnp.float32)


# ---- the fused Pallas kernel: grid = (batch, layer) ---------------------------
def fused_encoder_kernel(
    x_ref, mask_ref, embg_ref, embb_ref,
    wq_ref, bq_ref, wk_ref, bk_ref, wv_ref, bv_ref,
    wo_ref, bo_ref, g1_ref, be1_ref,
    w1_ref, b1_ref, w2_ref, b2_ref, g2_ref, be2_ref,
    wp_ref, bp_ref,
    o_ref,
    x_sc,
):
    """One (batch element, layer) step of the BERT-style forward."""
    li = pl.program_id(1)

    # Layer 0: initialise the resident hidden state from the embedding LayerNorm.
    @pl.when(li == 0)
    def _():
        x_sc[...] = _layernorm(x_ref[...], embg_ref[...], embb_ref[...])

    x = x_sc[...]            # (S, H) f32 hidden state (carried across layer axis)
    mask = mask_ref[...]     # (1, S) additive key mask (0 valid / -1e4 padded)

    # QKV projections; 1/sqrt(DH) already folded into Wq/bq on the host.
    q = _mm(x, wq_ref[...]) + bq_ref[...]
    k = _mm(x, wk_ref[...]) + bk_ref[...]
    v = _mm(x, wv_ref[...]) + bv_ref[...]

    # Per-head attention: NH small bf16 matmuls on static head slices.  The
    # batch grid axis already restricts keys to this sequence, so no
    # cross-batch mask / Q replication is needed.
    ctx_parts = []
    for h in range(NH):                                  # static unroll, NH small
        sl = slice(h * DH, (h + 1) * DH)
        qh = q[:, sl].astype(jnp.bfloat16)               # (S, DH)
        kh = k[:, sl].astype(jnp.bfloat16)
        vh = v[:, sl].astype(jnp.bfloat16)
        s = jax.lax.dot_general(qh, kh, (((1,), (1,)), ((), ())),
                                preferred_element_type=jnp.float32)   # (S, S)
        s = s + mask
        s = s - jnp.max(s, axis=-1, keepdims=True)
        p = jnp.exp(s)
        p = p * pl.reciprocal(jnp.sum(p, axis=-1, keepdims=True), approx=True)
        ctx_parts.append(
            jnp.dot(p.astype(jnp.bfloat16), vh,
                    preferred_element_type=jnp.float32))               # (S, DH)
    ctx = jnp.concatenate(ctx_parts, axis=-1)                          # (S, H)

    # Output projection + residual + LayerNorm, then FFN + residual + LayerNorm.
    attn = _mm(ctx, wo_ref[...]) + bo_ref[...]
    x1 = _layernorm(x + attn, g1_ref[...], be1_ref[...])

    hid = _gelu(_mm(x1, w1_ref[...]) + b1_ref[...])
    ffn = _mm(hid, w2_ref[...]) + b2_ref[...]
    x_out = _layernorm(x1 + ffn, g2_ref[...], be2_ref[...])
    x_sc[...] = x_out

    # Last layer: pooler on the whole (S, H) slab (sublane-dense store; better
    # MXU M-shape).  The wrapper slices the CLS row.
    @pl.when(li == L - 1)
    def _():
        pooled = jnp.tanh(_mm(x_out, wp_ref[...]) + bp_ref[...])
        o_ref[...] = pooled.astype(o_ref.dtype)


# ---- host-side input preparation (plain-JAX glue) ------------------------------
def _prepare_params(params):
    """Stack per-layer weights along L, fold the attention scale, cast to bf16."""
    _, _, _, ln_g, ln_b, layers, wp, bp = params
    scale = 1.0 / math.sqrt(DH)
    weight_idx = {0, 2, 4, 6, 10, 12}          # Wq, Wk, Wv, Wo, W1, W2
    stacked = []
    for idx in range(16):
        stk = jnp.stack([lp[idx] for lp in layers], axis=0)
        if idx in (0, 1):                      # fold 1/sqrt(DH) into Wq / bq
            stk = stk * scale
        stk = stk.astype(jnp.bfloat16 if idx in weight_idx else jnp.float32)
        stacked.append(stk)
    return stacked, ln_g, ln_b, wp.astype(jnp.bfloat16), bp.astype(jnp.float32)


def _embed(token_ids, params):
    # TODO(synk): string tokenization (HF AutoTokenizer) has no Pallas equivalent;
    # inputs are already-tokenized integer ids + attention mask.
    # Embedding table gather stays in plain JAX (no natural rectangular tile).
    word_emb, pos_emb, type_emb = params[0], params[1], params[2]
    x = (word_emb[token_ids]
         + pos_emb[jnp.arange(S)][None, :, :]
         + type_emb[0][None, None, :])
    return x.astype(jnp.float32)               # (B, S, H)


def transformer_encoder_forward(token_ids, attention_mask, params):
    """Pallas-backed equivalent of TransformerEncoder.forward (post-tokenization)."""
    x3d = _embed(token_ids, params)                                         # (B, S, H)
    mask_add = ((1.0 - attention_mask.astype(jnp.float32)) * NEG_INF)[:, None, :]  # (B,1,S)
    stacked, ln_g, ln_b, wp_b, bp = _prepare_params(params)

    def _full_spec(shape):
        return pl.BlockSpec(shape, lambda b, li: (0,) * len(shape))

    in_specs = [
        pl.BlockSpec((None, S, H), lambda b, li: (b, 0, 0)),   # embeddings (per batch)
        pl.BlockSpec((None, 1, S), lambda b, li: (b, 0, 0)),   # additive key mask
        _full_spec((1, H)),                                    # embedding LN gamma
        _full_spec((1, H)),                                    # embedding LN beta
    ]
    # Stacked (L, ...) per-layer tensors streamed along the layer grid axis.
    for arr in stacked:
        _, d1, d2 = arr.shape
        in_specs.append(pl.BlockSpec((None, d1, d2), lambda b, li: (li, 0, 0)))
    in_specs += [_full_spec((H, H)), _full_spec((1, H))]       # pooler Wp, bp

    pooled_slab = pl.pallas_call(
        fused_encoder_kernel,
        out_shape=jax.ShapeDtypeStruct((B, S, H), jnp.float32),
        grid_spec=pltpu.PrefetchScalarGridSpec(
            num_scalar_prefetch=0,
            grid=(B, L),                        # batch (parallel), layer (arbitrary)
            in_specs=in_specs,
            out_specs=pl.BlockSpec((None, S, H), lambda b, li: (b, 0, 0)),
            scratch_shapes=[pltpu.VMEM((S, H), jnp.float32)],   # resident hidden state
        ),
        compiler_params=pltpu.CompilerParams(
            dimension_semantics=("parallel", "arbitrary")),
    )(x3d, mask_add, ln_g, ln_b, *stacked, wp_b, bp)

    # pooler_output = tanh(hidden[:, 0] @ Wp + bp): slice the CLS rows.
    return pooled_slab[:, 0, :]                                 # (B, H)


# ---- pure-JAX reference (same math, f32, vectorized) ---------------------------
def reference_forward(token_ids, attention_mask, params):
    word_emb, pos_emb, type_emb, ln_g, ln_b, layers, wp, bp = params
    x = (word_emb[token_ids]
         + pos_emb[jnp.arange(S)][None, :, :]
         + type_emb[0][None, None, :])
    x = _layernorm(x, ln_g, ln_b)
    mask_add = ((1.0 - attention_mask.astype(jnp.float32)) * NEG_INF)[:, None, :]
    for lp in layers:
        wq, bq, wk, bk, wv, bv, wo, bo, g1, be1, w1, b1, w2, b2, g2, be2 = lp
        q = (x @ wq + bq).reshape(B, S, NH, DH).transpose(0, 2, 1, 3)
        k = (x @ wk + bk).reshape(B, S, NH, DH).transpose(0, 2, 1, 3)
        v = (x @ wv + bv).reshape(B, S, NH, DH).transpose(0, 2, 1, 3)
        s = jnp.einsum("bhqd,bhkd->bhqk", q, k) / math.sqrt(DH) + mask_add[:, None, :, :]
        p = jax.nn.softmax(s, axis=-1)
        ctx = jnp.einsum("bhqk,bhkd->bhqd", p, v).transpose(0, 2, 1, 3).reshape(B, S, H)
        x1 = _layernorm(x + ctx @ wo + bo, g1, be1)
        ffn = _gelu(x1 @ w1 + b1) @ w2 + b2
        x = _layernorm(x1 + ffn, g2, be2)
    return jnp.tanh(x[:, 0, :] @ wp + bp)


# ---- deterministic parameter init ----------------------------------------------
def init_params(key):
    def nrm(k, shape, scale=0.02):
        return (scale * jax.random.normal(k, shape)).astype(jnp.float32)

    keys = jax.random.split(key, 8 + L)
    word_emb = nrm(keys[0], (VOCAB, H))
    pos_emb = nrm(keys[1], (S, H))
    type_emb = nrm(keys[2], (2, H))
    ln_g = jnp.ones((1, H), jnp.float32)
    ln_b = jnp.zeros((1, H), jnp.float32)

    layers = []
    for li in range(L):
        lk = jax.random.split(keys[3 + li], 8)
        layers.append(tuple([
            nrm(lk[0], (H, H)), jnp.zeros((1, H), jnp.float32),   # Wq, bq
            nrm(lk[1], (H, H)), jnp.zeros((1, H), jnp.float32),   # Wk, bk
            nrm(lk[2], (H, H)), jnp.zeros((1, H), jnp.float32),   # Wv, bv
            nrm(lk[3], (H, H)), jnp.zeros((1, H), jnp.float32),   # Wo, bo
            jnp.ones((1, H), jnp.float32), jnp.zeros((1, H), jnp.float32),  # LN1
            nrm(lk[4], (H, F)), jnp.zeros((1, F), jnp.float32),   # W1, b1
            nrm(lk[5], (F, H)), jnp.zeros((1, H), jnp.float32),   # W2, b2
            jnp.ones((1, H), jnp.float32), jnp.zeros((1, H), jnp.float32),  # LN2
        ]))

    wp = nrm(keys[3 + L], (H, H))
    bp = jnp.zeros((1, H), jnp.float32)
    return (word_emb, pos_emb, type_emb, ln_g, ln_b, tuple(layers), wp, bp)


if __name__ == "__main__":
    key = jax.random.PRNGKey(0)
    k_ids, k_par = jax.random.split(key)

    # Synthetic "tokenized labels": (B, S) int ids + attention mask (with a bit
    # of padding on the second sequence to exercise the key mask).
    token_ids = jax.random.randint(k_ids, (B, S), 0, VOCAB, dtype=jnp.int32)
    attention_mask = jnp.ones((B, S), jnp.int32).at[1, S - 2:].set(0)

    params = init_params(k_par)

    out = transformer_encoder_forward(token_ids, attention_mask, params)
    out = jax.block_until_ready(out)

    ref = jax.block_until_ready(reference_forward(token_ids, attention_mask, params))

    assert out.shape == (B, H), out.shape
    assert bool(jnp.all(jnp.isfinite(out)))
    assert bool(jnp.allclose(out, ref, atol=2e-2, rtol=2e-2)), "mismatch vs JAX reference"

    print("KERNEL_OK")
</pallas_src>

<mosaic_0001>
module attributes {stable_mosaic.version = 11 : i64} {
  func.func @fused_encoder_kernel(%arg0: i32, %arg1: i32, %arg2: memref<1x8x32xf32, #tpu.memory_space<vmem>>, %arg3: memref<1x1x8xf32, #tpu.memory_space<vmem>>, %arg4: memref<1x32xf32, #tpu.memory_space<vmem>>, %arg5: memref<1x32xf32, #tpu.memory_space<vmem>>, %arg6: memref<1x32x32xbf16, #tpu.memory_space<vmem>>, %arg7: memref<1x1x32xf32, #tpu.memory_space<vmem>>, %arg8: memref<1x32x32xbf16, #tpu.memory_space<vmem>>, %arg9: memref<1x1x32xf32, #tpu.memory_space<vmem>>, %arg10: memref<1x32x32xbf16, #tpu.memory_space<vmem>>, %arg11: memref<1x1x32xf32, #tpu.memory_space<vmem>>, %arg12: memref<1x32x32xbf16, #tpu.memory_space<vmem>>, %arg13: memref<1x1x32xf32, #tpu.memory_space<vmem>>, %arg14: memref<1x1x32xf32, #tpu.memory_space<vmem>>, %arg15: memref<1x1x32xf32, #tpu.memory_space<vmem>>, %arg16: memref<1x32x64xbf16, #tpu.memory_space<vmem>>, %arg17: memref<1x1x64xf32, #tpu.memory_space<vmem>>, %arg18: memref<1x64x32xbf16, #tpu.memory_space<vmem>>, %arg19: memref<1x1x32xf32, #tpu.memory_space<vmem>>, %arg20: memref<1x1x32xf32, #tpu.memory_space<vmem>>, %arg21: memref<1x1x32xf32, #tpu.memory_space<vmem>>, %arg22: memref<32x32xbf16, #tpu.memory_space<vmem>>, %arg23: memref<1x32xf32, #tpu.memory_space<vmem>>, %arg24: memref<1x8x32xf32, #tpu.memory_space<vmem>>, %arg25: memref<8x32xf32, #tpu.memory_space<vmem>>) attributes {dimension_semantics = [#tpu.dimension_semantics<parallel>, #tpu.dimension_semantics<arbitrary>], iteration_bounds = array<i64: 2, 2>, scalar_prefetch = 0 : i64, scratch_operands = 1 : i64, tpu.core_type = #tpu.core_type<tc>, window_params = [{transform_indices = @transform_0, window_bounds = array<i64: 1, 8, 32>}, {transform_indices = @transform_1, window_bounds = array<i64: 1, 1, 8>}, {pipeline_mode = #tpu.pipeline_mode<synchronous>, transform_indices = @transform_2, window_bounds = array<i64: 1, 32>}, {pipeline_mode = #tpu.pipeline_mode<synchronous>, transform_indices = @transform_3, window_bounds = array<i64: 1, 32>}, {transform_indices = @transform_4, window_bounds = array<i64: 1, 32, 32>}, {transform_indices = @transform_5, window_bounds = array<i64: 1, 1, 32>}, {transform_indices = @transform_6, window_bounds = array<i64: 1, 32, 32>}, {transform_indices = @transform_7, window_bounds = array<i64: 1, 1, 32>}, {transform_indices = @transform_8, window_bounds = array<i64: 1, 32, 32>}, {transform_indices = @transform_9, window_bounds = array<i64: 1, 1, 32>}, {transform_indices = @transform_10, window_bounds = array<i64: 1, 32, 32>}, {transform_indices = @transform_11, window_bounds = array<i64: 1, 1, 32>}, {transform_indices = @transform_12, window_bounds = array<i64: 1, 1, 32>}, {transform_indices = @transform_13, window_bounds = array<i64: 1, 1, 32>}, {transform_indices = @transform_14, window_bounds = array<i64: 1, 32, 64>}, {transform_indices = @transform_15, window_bounds = array<i64: 1, 1, 64>}, {transform_indices = @transform_16, window_bounds = array<i64: 1, 64, 32>}, {transform_indices = @transform_17, window_bounds = array<i64: 1, 1, 32>}, {transform_indices = @transform_18, window_bounds = array<i64: 1, 1, 32>}, {transform_indices = @transform_19, window_bounds = array<i64: 1, 1, 32>}, {pipeline_mode = #tpu.pipeline_mode<synchronous>, transform_indices = @transform_20, window_bounds = array<i64: 32, 32>}, {pipeline_mode = #tpu.pipeline_mode<synchronous>, transform_indices = @transform_21, window_bounds = array<i64: 1, 32>}, {transform_indices = @transform_22, window_bounds = array<i64: 1, 8, 32>}]} {
    %c0_i32 = arith.constant 0 : i32
    %0 = arith.cmpi eq, %arg1, %c0_i32 : i32
    %1 = arith.extui %0 : i1 to i32
    %c0_i32_0 = arith.constant 0 : i32
    %2 = arith.cmpi ne, %1, %c0_i32_0 : i32
    scf.if %2 {
      %c0_91 = arith.constant 0 : index
      %c0_92 = arith.constant 0 : index
      %c0_93 = arith.constant 0 : index
      %210 = vector.load %arg2[%c0_91, %c0_92, %c0_93] : memref<1x8x32xf32, #tpu.memory_space<vmem>>, vector<1x8x32xf32>
      %211 = vector.shape_cast %210 : vector<1x8x32xf32> to vector<8x32xf32>
      %c0_94 = arith.constant 0 : index
      %c0_95 = arith.constant 0 : index
      %212 = vector.load %arg4[%c0_94, %c0_95] : memref<1x32xf32, #tpu.memory_space<vmem>>, vector<1x32xf32>
      %c0_96 = arith.constant 0 : index
      %c0_97 = arith.constant 0 : index
      %213 = vector.load %arg5[%c0_96, %c0_97] : memref<1x32xf32, #tpu.memory_space<vmem>>, vector<1x32xf32>
      %cst_98 = arith.constant dense<0.000000e+00> : vector<8xf32>
      %214 = vector.multi_reduction <add>, %211, %cst_98 [1] : vector<8x32xf32> to vector<8xf32>
      %215 = vector.shape_cast %214 : vector<8xf32> to vector<8x1xf32>
      %cst_99 = arith.constant 3.200000e+01 : f32
      %216 = vector.broadcast %cst_99 : f32 to vector<8x1xf32>
      %217 = arith.divf %215, %216 : vector<8x1xf32>
      %218 = vector.broadcast %217 : vector<8x1xf32> to vector<8x32xf32>
      %219 = arith.subf %211, %218 : vector<8x32xf32>
      %220 = arith.mulf %219, %219 : vector<8x32xf32>
      %cst_100 = arith.constant dense<0.000000e+00> : vector<8xf32>
      %221 = vector.multi_reduction <add>, %220, %cst_100 [1] : vector<8x32xf32> to vector<8xf32>
      %222 = vector.shape_cast %221 : vector<8xf32> to vector<8x1xf32>
      %cst_101 = arith.constant 3.200000e+01 : f32
      %223 = vector.broadcast %cst_101 : f32 to vector<8x1xf32>
      %224 = arith.divf %222, %223 : vector<8x1xf32>
      %225 = vector.broadcast %217 : vector<8x1xf32> to vector<8x32xf32>
      %226 = arith.subf %211, %225 : vector<8x32xf32>
      %cst_102 = arith.constant 9.99999996E-13 : f32
      %227 = vector.broadcast %cst_102 : f32 to vector<8x1xf32>
      %228 = arith.addf %224, %227 : vector<8x1xf32>
      %229 = math.rsqrt %228 : vector<8x1xf32>
      %230 = vector.broadcast %229 : vector<8x1xf32> to vector<8x32xf32>
      %231 = arith.mulf %226, %230 : vector<8x32xf32>
      %232 = vector.broadcast %212 : vector<1x32xf32> to vector<8x32xf32>
      %233 = arith.mulf %231, %232 : vector<8x32xf32>
      %234 = vector.broadcast %213 : vector<1x32xf32> to vector<8x32xf32>
      %235 = arith.addf %233, %234 : vector<8x32xf32>
      %c0_103 = arith.constant 0 : index
      %c0_104 = arith.constant 0 : index
      %236 = vector.load %arg25[%c0_103, %c0_104] : memref<8x32xf32, #tpu.memory_space<vmem>>, vector<8x32xf32>
      tpu.vector_store %arg25[%c0_103, %c0_104], %235 {strides = array<i32>} : memref<8x32xf32, #tpu.memory_space<vmem>>, vector<8x32xf32>,
    } else {
    }
    %c0 = arith.constant 0 : index
    %c0_1 = arith.constant 0 : index
    %3 = vector.load %arg25[%c0, %c0_1] : memref<8x32xf32, #tpu.memory_space<vmem>>, vector<8x32xf32>
    %c0_2 = arith.constant 0 : index
    %c0_3 = arith.constant 0 : index
    %c0_4 = arith.constant 0 : index
    %4 = vector.load %arg3[%c0_2, %c0_3, %c0_4] : memref<1x1x8xf32, #tpu.memory_space<vmem>>, vector<1x1x8xf32>
    %5 = vector.shape_cast %4 : vector<1x1x8xf32> to vector<1x8xf32>
    %c0_5 = arith.constant 0 : index
    %c0_6 = arith.constant 0 : index
    %c0_7 = arith.constant 0 : index
    %6 = vector.load %arg6[%c0_5, %c0_6, %c0_7] : memref<1x32x32xbf16, #tpu.memory_space<vmem>>, vector<1x32x32xbf16>
    %7 = vector.shape_cast %6 : vector<1x32x32xbf16> to vector<32x32xbf16>
    %8 = arith.truncf %3 : vector<8x32xf32> to vector<8x32xbf16>
    %cst = arith.constant dense<0.000000e+00> : vector<8x32xf32>
    %9 = tpu.matmul %8, %7, %cst {dimension_numbers = #tpu.dot_dimension_numbers<[1], [0], [0], [1], [0, 0, 1, 1], [], []>} : vector<8x32xbf16>, vector<32x32xbf16>, vector<8x32xf32> -> vector<8x32xf32>
    %c0_8 = arith.constant 0 : index
    %c0_9 = arith.constant 0 : index
    %c0_10 = arith.constant 0 : index
    %10 = vector.load %arg7[%c0_8, %c0_9, %c0_10] : memref<1x1x32xf32, #tpu.memory_space<vmem>>, vector<1x1x32xf32>
    %11 = vector.shape_cast %10 : vector<1x1x32xf32> to vector<1x32xf32>
    %12 = vector.broadcast %11 : vector<1x32xf32> to vector<8x32xf32>
    %13 = arith.addf %9, %12 : vector<8x32xf32>
    %c0_11 = arith.constant 0 : index
    %c0_12 = arith.constant 0 : index
    %c0_13 = arith.constant 0 : index
    %14 = vector.load %arg8[%c0_11, %c0_12, %c0_13] : memref<1x32x32xbf16, #tpu.memory_space<vmem>>, vector<1x32x32xbf16>
    %15 = vector.shape_cast %14 : vector<1x32x32xbf16> to vector<32x32xbf16>
    %16 = arith.truncf %3 : vector<8x32xf32> to vector<8x32xbf16>
    %cst_14 = arith.constant dense<0.000000e+00> : vector<8x32xf32>
    %17 = tpu.matmul %16, %15, %cst_14 {dimension_numbers = #tpu.dot_dimension_numbers<[1], [0], [0], [1], [0, 0, 1, 1], [], []>} : vector<8x32xbf16>, vector<32x32xbf16>, vector<8x32xf32> -> vector<8x32xf32>
    %c0_15 = arith.constant 0 : index
    %c0_16 = arith.constant 0 : index
    %c0_17 = arith.constant 0 : index
    %18 = vector.load %arg9[%c0_15, %c0_16, %c0_17] : memref<1x1x32xf32, #tpu.memory_space<vmem>>, vector<1x1x32xf32>
    %19 = vector.shape_cast %18 : vector<1x1x32xf32> to vector<1x32xf32>
    %20 = vector.broadcast %19 : vector<1x32xf32> to vector<8x32xf32>
    %21 = arith.addf %17, %20 : vector<8x32xf32>
    %c0_18 = arith.constant 0 : index
    %c0_19 = arith.constant 0 : index
    %c0_20 = arith.constant 0 : index
    %22 = vector.load %arg10[%c0_18, %c0_19, %c0_20] : memref<1x32x32xbf16, #tpu.memory_space<vmem>>, vector<1x32x32xbf16>
    %23 = vector.shape_cast %22 : vector<1x32x32xbf16> to vector<32x32xbf16>
    %24 = arith.truncf %3 : vector<8x32xf32> to vector<8x32xbf16>
    %cst_21 = arith.constant dense<0.000000e+00> : vector<8x32xf32>
    %25 = tpu.matmul %24, %23, %cst_21 {dimension_numbers = #tpu.dot_dimension_numbers<[1], [0], [0], [1], [0, 0, 1, 1], [], []>} : vector<8x32xbf16>, vector<32x32xbf16>, vector<8x32xf32> -> vector<8x32xf32>
    %c0_22 = arith.constant 0 : index
    %c0_23 = arith.constant 0 : index
    %c0_24 = arith.constant 0 : index
    %26 = vector.load %arg11[%c0_22, %c0_23, %c0_24] : memref<1x1x32xf32, #tpu.memory_space<vmem>>, vector<1x1x32xf32>
    %27 = vector.shape_cast %26 : vector<1x1x32xf32> to vector<1x32xf32>
    %28 = vector.broadcast %27 : vector<1x32xf32> to vector<8x32xf32>
    %29 = arith.addf %25, %28 : vector<8x32xf32>
    %30 = vector.extract_strided_slice %13 {offsets = [0, 0], sizes = [8, 8], strides = [1, 1]} : vector<8x32xf32> to vector<8x8xf32>
    %31 = arith.truncf %30 : vector<8x8xf32> to vector<8x8xbf16>
    %32 = vector.extract_strided_slice %21 {offsets = [0, 0], sizes = [8, 8], strides = [1, 1]} : vector<8x32xf32> to vector<8x8xf32>
    %33 = arith.truncf %32 : vector<8x8xf32> to vector<8x8xbf16>
    %34 = vector.extract_strided_slice %29 {offsets = [0, 0], sizes = [8, 8], strides = [1, 1]} : vector<8x32xf32> to vector<8x8xf32>
    %35 = arith.truncf %34 : vector<8x8xf32> to vector<8x8xbf16>
    %cst_25 = arith.constant dense<0.000000e+00> : vector<8x8xf32>
    %36 = tpu.matmul %31, %33, %cst_25 {dimension_numbers = #tpu.dot_dimension_numbers<[1], [1], [0], [0], [0, 0, 1, 0], [], []>} : vector<8x8xbf16>, vector<8x8xbf16>, vector<8x8xf32> -> vector<8x8xf32>
    %37 = vector.broadcast %5 : vector<1x8xf32> to vector<8x8xf32>
    %38 = arith.addf %36, %37 : vector<8x8xf32>
    %cst_26 = arith.constant dense<0xFF800000> : vector<8xf32>
    %39 = vector.multi_reduction <maximumf>, %38, %cst_26 [1] : vector<8x8xf32> to vector<8xf32>
    %40 = vector.shape_cast %39 : vector<8xf32> to vector<8x1xf32>
    %41 = vector.broadcast %40 : vector<8x1xf32> to vector<8x8xf32>
    %42 = arith.subf %38, %41 : vector<8x8xf32>
    %43 = math.exp %42 : vector<8x8xf32>
    %cst_27 = arith.constant dense<0.000000e+00> : vector<8xf32>
    %44 = vector.multi_reduction <add>, %43, %cst_27 [1] : vector<8x8xf32> to vector<8xf32>
    %45 = vector.shape_cast %44 : vector<8xf32> to vector<8x1xf32>
    %46 = tpu.reciprocal %45 {approx = true} : vector<8x1xf32> -> vector<8x1xf32>
    %47 = vector.broadcast %46 : vector<8x1xf32> to vector<8x8xf32>
    %48 = arith.mulf %43, %47 : vector<8x8xf32>
    %49 = arith.truncf %48 : vector<8x8xf32> to vector<8x8xbf16>
    %cst_28 = arith.constant dense<0.000000e+00> : vector<8x8xf32>
    %50 = tpu.matmul %49, %35, %cst_28 {dimension_numbers = #tpu.dot_dimension_numbers<[1], [0], [0], [1], [0, 0, 1, 1], [], []>} : vector<8x8xbf16>, vector<8x8xbf16>, vector<8x8xf32> -> vector<8x8xf32>
    %51 = vector.extract_strided_slice %13 {offsets = [0, 8], sizes = [8, 8], strides = [1, 1]} : vector<8x32xf32> to vector<8x8xf32>
    %52 = arith.truncf %51 : vector<8x8xf32> to vector<8x8xbf16>
    %53 = vector.extract_strided_slice %21 {offsets = [0, 8], sizes = [8, 8], strides = [1, 1]} : vector<8x32xf32> to vector<8x8xf32>
    %54 = arith.truncf %53 : vector<8x8xf32> to vector<8x8xbf16>
    %55 = vector.extract_strided_slice %29 {offsets = [0, 8], sizes = [8, 8], strides = [1, 1]} : vector<8x32xf32> to vector<8x8xf32>
    %56 = arith.truncf %55 : vector<8x8xf32> to vector<8x8xbf16>
    %cst_29 = arith.constant dense<0.000000e+00> : vector<8x8xf32>
    %57 = tpu.matmul %52, %54, %cst_29 {dimension_numbers = #tpu.dot_dimension_numbers<[1], [1], [0], [0], [0, 0, 1, 0], [], []>} : vector<8x8xbf16>, vector<8x8xbf16>, vector<8x8xf32> -> vector<8x8xf32>
    %58 = vector.broadcast %5 : vector<1x8xf32> to vector<8x8xf32>
    %59 = arith.addf %57, %58 : vector<8x8xf32>
    %cst_30 = arith.constant dense<0xFF800000> : vector<8xf32>
    %60 = vector.multi_reduction <maximumf>, %59, %cst_30 [1] : vector<8x8xf32> to vector<8xf32>
    %61 = vector.shape_cast %60 : vector<8xf32> to vector<8x1xf32>
    %62 = vector.broadcast %61 : vector<8x1xf32> to vector<8x8xf32>
    %63 = arith.subf %59, %62 : vector<8x8xf32>
    %64 = math.exp %63 : vector<8x8xf32>
    %cst_31 = arith.constant dense<0.000000e+00> : vector<8xf32>
    %65 = vector.multi_reduction <add>, %64, %cst_31 [1] : vector<8x8xf32> to vector<8xf32>
    %66 = vector.shape_cast %65 : vector<8xf32> to vector<8x1xf32>
    %67 = tpu.reciprocal %66 {approx = true} : vector<8x1xf32> -> vector<8x1xf32>
    %68 = vector.broadcast %67 : vector<8x1xf32> to vector<8x8xf32>
    %69 = arith.mulf %64, %68 : vector<8x8xf32>
    %70 = arith.truncf %69 : vector<8x8xf32> to vector<8x8xbf16>
    %cst_32 = arith.constant dense<0.000000e+00> : vector<8x8xf32>
    %71 = tpu.matmul %70, %56, %cst_32 {dimension_numbers = #tpu.dot_dimension_numbers<[1], [0], [0], [1], [0, 0, 1, 1], [], []>} : vector<8x8xbf16>, vector<8x8xbf16>, vector<8x8xf32> -> vector<8x8xf32>
    %72 = vector.extract_strided_slice %13 {offsets = [0, 16], sizes = [8, 8], strides = [1, 1]} : vector<8x32xf32> to vector<8x8xf32>
    %73 = arith.truncf %72 : vector<8x8xf32> to vector<8x8xbf16>
    %74 = vector.extract_strided_slice %21 {offsets = [0, 16], sizes = [8, 8], strides = [1, 1]} : vector<8x32xf32> to vector<8x8xf32>
    %75 = arith.truncf %74 : vector<8x8xf32> to vector<8x8xbf16>
    %76 = vector.extract_strided_slice %29 {offsets = [0, 16], sizes = [8, 8], strides = [1, 1]} : vector<8x32xf32> to vector<8x8xf32>
    %77 = arith.truncf %76 : vector<8x8xf32> to vector<8x8xbf16>
    %cst_33 = arith.constant dense<0.000000e+00> : vector<8x8xf32>
    %78 = tpu.matmul %73, %75, %cst_33 {dimension_numbers = #tpu.dot_dimension_numbers<[1], [1], [0], [0], [0, 0, 1, 0], [], []>} : vector<8x8xbf16>, vector<8x8xbf16>, vector<8x8xf32> -> vector<8x8xf32>
    %79 = vector.broadcast %5 : vector<1x8xf32> to vector<8x8xf32>
    %80 = arith.addf %78, %79 : vector<8x8xf32>
    %cst_34 = arith.constant dense<0xFF800000> : vector<8xf32>
    %81 = vector.multi_reduction <maximumf>, %80, %cst_34 [1] : vector<8x8xf32> to vector<8xf32>
    %82 = vector.shape_cast %81 : vector<8xf32> to vector<8x1xf32>
    %83 = vector.broadcast %82 : vector<8x1xf32> to vector<8x8xf32>
    %84 = arith.subf %80, %83 : vector<8x8xf32>
    %85 = math.exp %84 : vector<8x8xf32>
    %cst_35 = arith.constant dense<0.000000e+00> : vector<8xf32>
    %86 = vector.multi_reduction <add>, %85, %cst_35 [1] : vector<8x8xf32> to vector<8xf32>
    %87 = vector.shape_cast %86 : vector<8xf32> to vector<8x1xf32>
    %88 = tpu.reciprocal %87 {approx = true} : vector<8x1xf32> -> vector<8x1xf32>
    %89 = vector.broadcast %88 : vector<8x1xf32> to vector<8x8xf32>
    %90 = arith.mulf %85, %89 : vector<8x8xf32>
    %91 = arith.truncf %90 : vector<8x8xf32> to vector<8x8xbf16>
    %cst_36 = arith.constant dense<0.000000e+00> : vector<8x8xf32>
    %92 = tpu.matmul %91, %77, %cst_36 {dimension_numbers = #tpu.dot_dimension_numbers<[1], [0], [0], [1], [0, 0, 1, 1], [], []>} : vector<8x8xbf16>, vector<8x8xbf16>, vector<8x8xf32> -> vector<8x8xf32>
    %93 = vector.extract_strided_slice %13 {offsets = [0, 24], sizes = [8, 8], strides = [1, 1]} : vector<8x32xf32> to vector<8x8xf32>
    %94 = arith.truncf %93 : vector<8x8xf32> to vector<8x8xbf16>
    %95 = vector.extract_strided_slice %21 {offsets = [0, 24], sizes = [8, 8], strides = [1, 1]} : vector<8x32xf32> to vector<8x8xf32>
    %96 = arith.truncf %95 : vector<8x8xf32> to vector<8x8xbf16>
    %97 = vector.extract_strided_slice %29 {offsets = [0, 24], sizes = [8, 8], strides = [1, 1]} : vector<8x32xf32> to vector<8x8xf32>
    %98 = arith.truncf %97 : vector<8x8xf32> to vector<8x8xbf16>
    %cst_37 = arith.constant dense<0.000000e+00> : vector<8x8xf32>
    %99 = tpu.matmul %94, %96, %cst_37 {dimension_numbers = #tpu.dot_dimension_numbers<[1], [1], [0], [0], [0, 0, 1, 0], [], []>} : vector<8x8xbf16>, vector<8x8xbf16>, vector<8x8xf32> -> vector<8x8xf32>
    %100 = vector.broadcast %5 : vector<1x8xf32> to vector<8x8xf32>
    %101 = arith.addf %99, %100 : vector<8x8xf32>
    %cst_38 = arith.constant dense<0xFF800000> : vector<8xf32>
    %102 = vector.multi_reduction <maximumf>, %101, %cst_38 [1] : vector<8x8xf32> to vector<8xf32>
    %103 = vector.shape_cast %102 : vector<8xf32> to vector<8x1xf32>
    %104 = vector.broadcast %103 : vector<8x1xf32> to vector<8x8xf32>
    %105 = arith.subf %101, %104 : vector<8x8xf32>
    %106 = math.exp %105 : vector<8x8xf32>
    %cst_39 = arith.constant dense<0.000000e+00> : vector<8xf32>
    %107 = vector.multi_reduction <add>, %106, %cst_39 [1] : vector<8x8xf32> to vector<8xf32>
    %108 = vector.shape_cast %107 : vector<8xf32> to vector<8x1xf32>
    %109 = tpu.reciprocal %108 {approx = true} : vector<8x1xf32> -> vector<8x1xf32>
    %110 = vector.broadcast %109 : vector<8x1xf32> to vector<8x8xf32>
    %111 = arith.mulf %106, %110 : vector<8x8xf32>
    %112 = arith.truncf %111 : vector<8x8xf32> to vector<8x8xbf16>
    %cst_40 = arith.constant dense<0.000000e+00> : vector<8x8xf32>
    %113 = tpu.matmul %112, %98, %cst_40 {dimension_numbers = #tpu.dot_dimension_numbers<[1], [0], [0], [1], [0, 0, 1, 1], [], []>} : vector<8x8xbf16>, vector<8x8xbf16>, vector<8x8xf32> -> vector<8x8xf32>
    %114 = tpu.concatenate %50, %71, %92, %113 in 1 : vector<8x8xf32>, vector<8x8xf32>, vector<8x8xf32>, vector<8x8xf32> -> vector<8x32xf32>
    %c0_41 = arith.constant 0 : index
    %c0_42 = arith.constant 0 : index
    %c0_43 = arith.constant 0 : index
    %115 = vector.load %arg12[%c0_41, %c0_42, %c0_43] : memref<1x32x32xbf16, #tpu.memory_space<vmem>>, vector<1x32x32xbf16>
    %116 = vector.shape_cast %115 : vector<1x32x32xbf16> to vector<32x32xbf16>
    %117 = arith.truncf %114 : vector<8x32xf32> to vector<8x32xbf16>
    %cst_44 = arith.constant dense<0.000000e+00> : vector<8x32xf32>
    %118 = tpu.matmul %117, %116, %cst_44 {dimension_numbers = #tpu.dot_dimension_numbers<[1], [0], [0], [1], [0, 0, 1, 1], [], []>} : vector<8x32xbf16>, vector<32x32xbf16>, vector<8x32xf32> -> vector<8x32xf32>
    %c0_45 = arith.constant 0 : index
    %c0_46 = arith.constant 0 : index
    %c0_47 = arith.constant 0 : index
    %119 = vector.load %arg13[%c0_45, %c0_46, %c0_47] : memref<1x1x32xf32, #tpu.memory_space<vmem>>, vector<1x1x32xf32>
    %120 = vector.shape_cast %119 : vector<1x1x32xf32> to vector<1x32xf32>
    %121 = vector.broadcast %120 : vector<1x32xf32> to vector<8x32xf32>
    %122 = arith.addf %118, %121 : vector<8x32xf32>
    %123 = arith.addf %3, %122 : vector<8x32xf32>
    %c0_48 = arith.constant 0 : index
    %c0_49 = arith.constant 0 : index
    %c0_50 = arith.constant 0 : index
    %124 = vector.load %arg14[%c0_48, %c0_49, %c0_50] : memref<1x1x32xf32, #tpu.memory_space<vmem>>, vector<1x1x32xf32>
    %125 = vector.shape_cast %124 : vector<1x1x32xf32> to vector<1x32xf32>
    %c0_51 = arith.constant 0 : index
    %c0_52 = arith.constant 0 : index
    %c0_53 = arith.constant 0 : index
    %126 = vector.load %arg15[%c0_51, %c0_52, %c0_53] : memref<1x1x32xf32, #tpu.memory_space<vmem>>, vector<1x1x32xf32>
    %127 = vector.shape_cast %126 : vector<1x1x32xf32> to vector<1x32xf32>
    %cst_54 = arith.constant dense<0.000000e+00> : vector<8xf32>
    %128 = vector.multi_reduction <add>, %123, %cst_54 [1] : vector<8x32xf32> to vector<8xf32>
    %129 = vector.shape_cast %128 : vector<8xf32> to vector<8x1xf32>
    %cst_55 = arith.constant 3.200000e+01 : f32
    %130 = vector.broadcast %cst_55 : f32 to vector<8x1xf32>
    %131 = arith.divf %129, %130 : vector<8x1xf32>
    %132 = vector.broadcast %131 : vector<8x1xf32> to vector<8x32xf32>
    %133 = arith.subf %123, %132 : vector<8x32xf32>
    %134 = arith.mulf %133, %133 : vector<8x32xf32>
    %cst_56 = arith.constant dense<0.000000e+00> : vector<8xf32>
    %135 = vector.multi_reduction <add>, %134, %cst_56 [1] : vector<8x32xf32> to vector<8xf32>
    %136 = vector.shape_cast %135 : vector<8xf32> to vector<8x1xf32>
    %cst_57 = arith.constant 3.200000e+01 : f32
    %137 = vector.broadcast %cst_57 : f32 to vector<8x1xf32>
    %138 = arith.divf %136, %137 : vector<8x1xf32>
    %139 = vector.broadcast %131 : vector<8x1xf32> to vector<8x32xf32>
    %140 = arith.subf %123, %139 : vector<8x32xf32>
    %cst_58 = arith.constant 9.99999996E-13 : f32
    %141 = vector.broadcast %cst_58 : f32 to vector<8x1xf32>
    %142 = arith.addf %138, %141 : vector<8x1xf32>
    %143 = math.rsqrt %142 : vector<8x1xf32>
    %144 = vector.broadcast %143 : vector<8x1xf32> to vector<8x32xf32>
    %145 = arith.mulf %140, %144 : vector<8x32xf32>
    %146 = vector.broadcast %125 : vector<1x32xf32> to vector<8x32xf32>
    %147 = arith.mulf %145, %146 : vector<8x32xf32>
    %148 = vector.broadcast %127 : vector<1x32xf32> to vector<8x32xf32>
    %149 = arith.addf %147, %148 : vector<8x32xf32>
    %c0_59 = arith.constant 0 : index
    %c0_60 = arith.constant 0 : index
    %c0_61 = arith.constant 0 : index
    %150 = vector.load %arg16[%c0_59, %c0_60, %c0_61] : memref<1x32x64xbf16, #tpu.memory_space<vmem>>, vector<1x32x64xbf16>
    %151 = vector.shape_cast %150 : vector<1x32x64xbf16> to vector<32x64xbf16>
    %152 = arith.truncf %149 : vector<8x32xf32> to vector<8x32xbf16>
    %cst_62 = arith.constant dense<0.000000e+00> : vector<8x64xf32>
    %153 = tpu.matmul %152, %151, %cst_62 {dimension_numbers = #tpu.dot_dimension_numbers<[1], [0], [0], [1], [0, 0, 1, 1], [], []>} : vector<8x32xbf16>, vector<32x64xbf16>, vector<8x64xf32> -> vector<8x64xf32>
    %c0_63 = arith.constant 0 : index
    %c0_64 = arith.constant 0 : index
    %c0_65 = arith.constant 0 : index
    %154 = vector.load %arg17[%c0_63, %c0_64, %c0_65] : memref<1x1x64xf32, #tpu.memory_space<vmem>>, vector<1x1x64xf32>
    %155 = vector.shape_cast %154 : vector<1x1x64xf32> to vector<1x64xf32>
    %156 = vector.broadcast %155 : vector<1x64xf32> to vector<8x64xf32>
    %157 = arith.addf %153, %156 : vector<8x64xf32>
    %cst_66 = arith.constant 5.000000e-01 : f32
    %158 = vector.broadcast %cst_66 : f32 to vector<8x64xf32>
    %159 = arith.mulf %158, %157 : vector<8x64xf32>
    %cst_67 = arith.constant 4.471500e-02 : f32
    %160 = vector.broadcast %cst_67 : f32 to vector<8x64xf32>
    %161 = arith.mulf %160, %157 : vector<8x64xf32>
    %162 = arith.mulf %161, %157 : vector<8x64xf32>
    %163 = arith.mulf %162, %157 : vector<8x64xf32>
    %164 = arith.addf %157, %163 : vector<8x64xf32>
    %cst_68 = arith.constant 0.797884583 : f32
    %165 = vector.broadcast %cst_68 : f32 to vector<8x64xf32>
    %166 = arith.mulf %165, %164 : vector<8x64xf32>
    %167 = math.tanh %166 : vector<8x64xf32>
    %cst_69 = arith.constant 1.000000e+00 : f32
    %168 = vector.broadcast %cst_69 : f32 to vector<8x64xf32>
    %169 = arith.addf %168, %167 : vector<8x64xf32>
    %170 = arith.mulf %159, %169 : vector<8x64xf32>
    %c0_70 = arith.constant 0 : index
    %c0_71 = arith.constant 0 : index
    %c0_72 = arith.constant 0 : index
    %171 = vector.load %arg18[%c0_70, %c0_71, %c0_72] : memref<1x64x32xbf16, #tpu.memory_space<vmem>>, vector<1x64x32xbf16>
    %172 = vector.shape_cast %171 : vector<1x64x32xbf16> to vector<64x32xbf16>
    %173 = arith.truncf %170 : vector<8x64xf32> to vector<8x64xbf16>
    %cst_73 = arith.constant dense<0.000000e+00> : vector<8x32xf32>
    %174 = tpu.matmul %173, %172, %cst_73 {dimension_numbers = #tpu.dot_dimension_numbers<[1], [0], [0], [1], [0, 0, 1, 1], [], []>} : vector<8x64xbf16>, vector<64x32xbf16>, vector<8x32xf32> -> vector<8x32xf32>
    %c0_74 = arith.constant 0 : index
    %c0_75 = arith.constant 0 : index
    %c0_76 = arith.constant 0 : index
    %175 = vector.load %arg19[%c0_74, %c0_75, %c0_76] : memref<1x1x32xf32, #tpu.memory_space<vmem>>, vector<1x1x32xf32>
    %176 = vector.shape_cast %175 : vector<1x1x32xf32> to vector<1x32xf32>
    %177 = vector.broadcast %176 : vector<1x32xf32> to vector<8x32xf32>
    %178 = arith.addf %174, %177 : vector<8x32xf32>
    %179 = arith.addf %149, %178 : vector<8x32xf32>
    %c0_77 = arith.constant 0 : index
    %c0_78 = arith.constant 0 : index
    %c0_79 = arith.constant 0 : index
    %180 = vector.load %arg20[%c0_77, %c0_78, %c0_79] : memref<1x1x32xf32, #tpu.memory_space<vmem>>, vector<1x1x32xf32>
    %181 = vector.shape_cast %180 : vector<1x1x32xf32> to vector<1x32xf32>
    %c0_80 = arith.constant 0 : index
    %c0_81 = arith.constant 0 : index
    %c0_82 = arith.constant 0 : index
    %182 = vector.load %arg21[%c0_80, %c0_81, %c0_82] : memref<1x1x32xf32, #tpu.memory_space<vmem>>, vector<1x1x32xf32>
    %183 = vector.shape_cast %182 : vector<1x1x32xf32> to vector<1x32xf32>
    %cst_83 = arith.constant dense<0.000000e+00> : vector<8xf32>
    %184 = vector.multi_reduction <add>, %179, %cst_83 [1] : vector<8x32xf32> to vector<8xf32>
    %185 = vector.shape_cast %184 : vector<8xf32> to vector<8x1xf32>
    %cst_84 = arith.constant 3.200000e+01 : f32
    %186 = vector.broadcast %cst_84 : f32 to vector<8x1xf32>
    %187 = arith.divf %185, %186 : vector<8x1xf32>
    %188 = vector.broadcast %187 : vector<8x1xf32> to vector<8x32xf32>
    %189 = arith.subf %179, %188 : vector<8x32xf32>
    %190 = arith.mulf %189, %189 : vector<8x32xf32>
    %cst_85 = arith.constant dense<0.000000e+00> : vector<8xf32>
    %191 = vector.multi_reduction <add>, %190, %cst_85 [1] : vector<8x32xf32> to vector<8xf32>
    %192 = vector.shape_cast %191 : vector<8xf32> to vector<8x1xf32>
    %cst_86 = arith.constant 3.200000e+01 : f32
    %193 = vector.broadcast %cst_86 : f32 to vector<8x1xf32>
    %194 = arith.divf %192, %193 : vector<8x1xf32>
    %195 = vector.broadcast %187 : vector<8x1xf32> to vector<8x32xf32>
    %196 = arith.subf %179, %195 : vector<8x32xf32>
    %cst_87 = arith.constant 9.99999996E-13 : f32
    %197 = vector.broadcast %cst_87 : f32 to vector<8x1xf32>
    %198 = arith.addf %194, %197 : vector<8x1xf32>
    %199 = math.rsqrt %198 : vector<8x1xf32>
    %200 = vector.broadcast %199 : vector<8x1xf32> to vector<8x32xf32>
    %201 = arith.mulf %196, %200 : vector<8x32xf32>
    %202 = vector.broadcast %181 : vector<1x32xf32> to vector<8x32xf32>
    %203 = arith.mulf %201, %202 : vector<8x32xf32>
    %204 = vector.broadcast %183 : vector<1x32xf32> to vector<8x32xf32>
    %205 = arith.addf %203, %204 : vector<8x32xf32>
    %c0_88 = arith.constant 0 : index
    %c0_89 = arith.constant 0 : index
    %206 = vector.load %arg25[%c0_88, %c0_89] : memref<8x32xf32, #tpu.memory_space<vmem>>, vector<8x32xf32>
    tpu.vector_store %arg25[%c0_88, %c0_89], %205 {strides = array<i32>} : memref<8x32xf32, #tpu.memory_space<vmem>>, vector<8x32xf32>,
    %c1_i32 = arith.constant 1 : i32
    %207 = arith.cmpi eq, %arg1, %c1_i32 : i32
    %208 = arith.extui %207 : i1 to i32
    %c0_i32_90 = arith.constant 0 : i32
    %209 = arith.cmpi ne, %208, %c0_i32_90 : i32
    scf.if %209 {
      %c0_91 = arith.constant 0 : index
      %c0_92 = arith.constant 0 : index
      %210 = vector.load %arg22[%c0_91, %c0_92] : memref<32x32xbf16, #tpu.memory_space<vmem>>, vector<32x32xbf16>
      %211 = arith.truncf %205 : vector<8x32xf32> to vector<8x32xbf16>
      %cst_93 = arith.constant dense<0.000000e+00> : vector<8x32xf32>
      %212 = tpu.matmul %211, %210, %cst_93 {dimension_numbers = #tpu.dot_dimension_numbers<[1], [0], [0], [1], [0, 0, 1, 1], [], []>} : vector<8x32xbf16>, vector<32x32xbf16>, vector<8x32xf32> -> vector<8x32xf32>
      %c0_94 = arith.constant 0 : index
      %c0_95 = arith.constant 0 : index
      %213 = vector.load %arg23[%c0_94, %c0_95] : memref<1x32xf32, #tpu.memory_space<vmem>>, vector<1x32xf32>
      %214 = vector.broadcast %213 : vector<1x32xf32> to vector<8x32xf32>
      %215 = arith.addf %212, %214 : vector<8x32xf32>
      %216 = math.tanh %215 : vector<8x32xf32>
      %c0_96 = arith.constant 0 : index
      %c0_97 = arith.constant 0 : index
      %c0_98 = arith.constant 0 : index
      %217 = vector.load %arg24[%c0_96, %c0_97, %c0_98] : memref<1x8x32xf32, #tpu.memory_space<vmem>>, vector<1x8x32xf32>
      %218 = vector.shape_cast %217 : vector<1x8x32xf32> to vector<8x32xf32>
      %219 = vector.shape_cast %216 : vector<8x32xf32> to vector<1x8x32xf32>
      tpu.vector_store %arg24[%c0_96, %c0_97, %c0_98], %219 {strides = array<i32>} : memref<1x8x32xf32, #tpu.memory_space<vmem>>, vector<1x8x32xf32>,
    } else {
    }
    return
  }
  func.func @transform_0(%arg0: i32, %arg1: i32) -> (i32, i32, i32) {
    %c0_i32 = arith.constant 0 : i32
    %c0_i32_0 = arith.constant 0 : i32
    %c0_i32_1 = arith.constant 0 : i32
    return %arg0, %c0_i32, %c0_i32_0 : i32, i32, i32
  }
  func.func @transform_1(%arg0: i32, %arg1: i32) -> (i32, i32, i32) {
    %c0_i32 = arith.constant 0 : i32
    %c0_i32_0 = arith.constant 0 : i32
    %c0_i32_1 = arith.constant 0 : i32
    return %arg0, %c0_i32, %c0_i32_0 : i32, i32, i32
  }
  func.func @transform_2(%arg0: i32, %arg1: i32) -> (i32, i32) {
    %c0_i32 = arith.constant 0 : i32
    %c0_i32_0 = arith.constant 0 : i32
    %c0_i32_1 = arith.constant 0 : i32
    return %c0_i32, %c0_i32_0 : i32, i32
  }
  func.func @transform_3(%arg0: i32, %arg1: i32) -> (i32, i32) {
    %c0_i32 = arith.constant 0 : i32
    %c0_i32_0 = arith.constant 0 : i32
    %c0_i32_1 = arith.constant 0 : i32
    return %c0_i32, %c0_i32_0 : i32, i32
  }
  func.func @transform_4(%arg0: i32, %arg1: i32) -> (i32, i32, i32) {
    %c0_i32 = arith.constant 0 : i32
    %c0_i32_0 = arith.constant 0 : i32
    %c0_i32_1 = arith.constant 0 : i32
    return %arg1, %c0_i32, %c0_i32_0 : i32, i32, i32
  }
  func.func @transform_5(%arg0: i32, %arg1: i32) -> (i32, i32, i32) {
    %c0_i32 = arith.constant 0 : i32
    %c0_i32_0 = arith.constant 0 : i32
    %c0_i32_1 = arith.constant 0 : i32
    return %arg1, %c0_i32, %c0_i32_0 : i32, i32, i32
  }
  func.func @transform_6(%arg0: i32, %arg1: i32) -> (i32, i32, i32) {
    %c0_i32 = arith.constant 0 : i32
    %c0_i32_0 = arith.constant 0 : i32
    %c0_i32_1 = arith.constant 0 : i32
    return %arg1, %c0_i32, %c0_i32_0 : i32, i32, i32
  }
  func.func @transform_7(%arg0: i32, %arg1: i32) -> (i32, i32, i32) {
    %c0_i32 = arith.constant 0 : i32
    %c0_i32_0 = arith.constant 0 : i32
    %c0_i32_1 = arith.constant 0 : i32
    return %arg1, %c0_i32, %c0_i32_0 : i32, i32, i32
  }
  func.func @transform_8(%arg0: i32, %arg1: i32) -> (i32, i32, i32) {
    %c0_i32 = arith.constant 0 : i32
    %c0_i32_0 = arith.constant 0 : i32
    %c0_i32_1 = arith.constant 0 : i32
    return %arg1, %c0_i32, %c0_i32_0 : i32, i32, i32
  }
  func.func @transform_9(%arg0: i32, %arg1: i32) -> (i32, i32, i32) {
    %c0_i32 = arith.constant 0 : i32
    %c0_i32_0 = arith.constant 0 : i32
    %c0_i32_1 = arith.constant 0 : i32
    return %arg1, %c0_i32, %c0_i32_0 : i32, i32, i32
  }
  func.func @transform_10(%arg0: i32, %arg1: i32) -> (i32, i32, i32) {
    %c0_i32 = arith.constant 0 : i32
    %c0_i32_0 = arith.constant 0 : i32
    %c0_i32_1 = arith.constant 0 : i32
    return %arg1, %c0_i32, %c0_i32_0 : i32, i32, i32
  }
  func.func @transform_11(%arg0: i32, %arg1: i32) -> (i32, i32, i32) {
    %c0_i32 = arith.constant 0 : i32
    %c0_i32_0 = arith.constant 0 : i32
    %c0_i32_1 = arith.constant 0 : i32
    return %arg1, %c0_i32, %c0_i32_0 : i32, i32, i32
  }
  func.func @transform_12(%arg0: i32, %arg1: i32) -> (i32, i32, i32) {
    %c0_i32 = arith.constant 0 : i32
    %c0_i32_0 = arith.constant 0 : i32
    %c0_i32_1 = arith.constant 0 : i32
    return %arg1, %c0_i32, %c0_i32_0 : i32, i32, i32
  }
  func.func @transform_13(%arg0: i32, %arg1: i32) -> (i32, i32, i32) {
    %c0_i32 = arith.constant 0 : i32
    %c0_i32_0 = arith.constant 0 : i32
    %c0_i32_1 = arith.constant 0 : i32
    return %arg1, %c0_i32, %c0_i32_0 : i32, i32, i32
  }
  func.func @transform_14(%arg0: i32, %arg1: i32) -> (i32, i32, i32) {
    %c0_i32 = arith.constant 0 : i32
    %c0_i32_0 = arith.constant 0 : i32
    %c0_i32_1 = arith.constant 0 : i32
    return %arg1, %c0_i32, %c0_i32_0 : i32, i32, i32
  }
  func.func @transform_15(%arg0: i32, %arg1: i32) -> (i32, i32, i32) {
    %c0_i32 = arith.constant 0 : i32
    %c0_i32_0 = arith.constant 0 : i32
    %c0_i32_1 = arith.constant 0 : i32
    return %arg1, %c0_i32, %c0_i32_0 : i32, i32, i32
  }
  func.func @transform_16(%arg0: i32, %arg1: i32) -> (i32, i32, i32) {
    %c0_i32 = arith.constant 0 : i32
    %c0_i32_0 = arith.constant 0 : i32
    %c0_i32_1 = arith.constant 0 : i32
    return %arg1, %c0_i32, %c0_i32_0 : i32, i32, i32
  }
  func.func @transform_17(%arg0: i32, %arg1: i32) -> (i32, i32, i32) {
    %c0_i32 = arith.constant 0 : i32
    %c0_i32_0 = arith.constant 0 : i32
    %c0_i32_1 = arith.constant 0 : i32
    return %arg1, %c0_i32, %c0_i32_0 : i32, i32, i32
  }
  func.func @transform_18(%arg0: i32, %arg1: i32) -> (i32, i32, i32) {
    %c0_i32 = arith.constant 0 : i32
    %c0_i32_0 = arith.constant 0 : i32
    %c0_i32_1 = arith.constant 0 : i32
    return %arg1, %c0_i32, %c0_i32_0 : i32, i32, i32
  }
  func.func @transform_19(%arg0: i32, %arg1: i32) -> (i32, i32, i32) {
    %c0_i32 = arith.constant 0 : i32
    %c0_i32_0 = arith.constant 0 : i32
    %c0_i32_1 = arith.constant 0 : i32
    return %arg1, %c0_i32, %c0_i32_0 : i32, i32, i32
  }
  func.func @transform_20(%arg0: i32, %arg1: i32) -> (i32, i32) {
    %c0_i32 = arith.constant 0 : i32
    %c0_i32_0 = arith.constant 0 : i32
    %c0_i32_1 = arith.constant 0 : i32
    return %c0_i32, %c0_i32_0 : i32, i32
  }
  func.func @transform_21(%arg0: i32, %arg1: i32) -> (i32, i32) {
    %c0_i32 = arith.constant 0 : i32
    %c0_i32_0 = arith.constant 0 : i32
    %c0_i32_1 = arith.constant 0 : i32
    return %c0_i32, %c0_i32_0 : i32, i32
  }
  func.func @transform_22(%arg0: i32, %arg1: i32) -> (i32, i32, i32) {
    %c0_i32 = arith.constant 0 : i32
    %c0_i32_0 = arith.constant 0 : i32
    %c0_i32_1 = arith.constant 0 : i32
    return %arg0, %c0_i32, %c0_i32_0 : i32, i32, i32
  }
}

</mosaic_0001>

<bundles_post_ra>
// kernel: tpu_custom_call.1
= control target key start
LH: loop header
LB: loop body
LE: loop exit
PB: predicated region body
PF: predicated region fallthrough
CT: control target
= control target key end

     0   :  { %s4107_s0 = inlined_call_operand.hbm [shape: f32[2,8,32], index: 0, kind: input, shape index: {}]   ;;  %s4108_s1 = inlined_call_operand.vmem [shape: f32[2,1,8], index: 1, kind: input, shape index: {}]   ;;  %s4109_s2 = inlined_call_operand.hbm [shape: f32[1,32], index: 2, kind: input, shape index: {}]   ;;  %s4110_s3 = inlined_call_operand.hbm [shape: f32[1,32], index: 3, kind: input, shape index: {}]   ;;  %s4111_s4 = inlined_call_operand.vmem [shape: bf16[2,32,32], index: 4, kind: input, shape index: {}]   ;;  %s4112_s5 = inlined_call_operand.hbm [shape: f32[2,1,32], index: 5, kind: input, shape index: {}]   ;;  %s4113_s6 = inlined_call_operand.vmem [shape: bf16[2,32,32], index: 6, kind: input, shape index: {}]   ;;  %s4114_s7 = inlined_call_operand.vmem [shape: f32[2,1,32], index: 7, kind: input, shape index: {}]   ;;  %s4115_s8 = inlined_call_operand.vmem [shape: bf16[2,32,32], index: 8, kind: input, shape index: {}]   ;;  %s4116_s9 = inlined_call_operand.vmem [shape: f32[2,1,32], index: 9, kind: input, shape index: {}]   ;;  %s4117_s10 = inlined_call_operand.hbm [shape: bf16[2,32,32], index: 10, kind: input, shape index: {}]   ;;  %s4118_s11 = inlined_call_operand.vmem [shape: f32[2,1,32], index: 11, kind: input, shape index: {}]   ;;  %s4119_s12 = inlined_call_operand.vmem [shape: f32[2,1,32], index: 12, kind: input, shape index: {}]   ;;  %s4120_s13 = inlined_call_operand.vmem [shape: f32[2,1,32], index: 13, kind: input, shape index: {}]   ;;  %s4121_s14 = inlined_call_operand.hbm [shape: bf16[2,32,64], index: 14, kind: input, shape index: {}]   ;;  %s4122_s15 = inlined_call_operand.hbm [shape: f32[2,1,64], index: 15, kind: input, shape index: {}]   ;;  %s4123_s16 = inlined_call_operand.vmem [shape: bf16[2,64,32], index: 16, kind: input, shape index: {}]   ;;  %s4124_s17 = inlined_call_operand.vmem [shape: f32[2,1,32], index: 17, kind: input, shape index: {}]   ;;  %s4125_s18 = inlined_call_operand.vmem [shape: f32[2,1,32], index: 18, kind: input, shape index: {}]   ;;  %s4126_s19 = inlined_call_operand.vmem [shape: f32[2,1,32], index: 19, kind: input, shape index: {}]   ;;  %s4127_s20 = inlined_call_operand.vmem [shape: bf16[32,32], index: 20, kind: input, shape index: {}]   ;;  %s4128_s21 = inlined_call_operand.vmem [shape: f32[1,32], index: 21, kind: input, shape index: {}]   ;;  %s4129_s22 = inlined_call_operand.hbm [shape: f32[2,8,32], index: 22, kind: output, shape index: {}]  }
   0x1   :  { %4181 = sst [smem:[#allocation40_spill]] %s4107_s0 }
   0x2   :  { %4182 = sst [smem:[#allocation41_spill]] %s4108_s1 }
   0x3   :  { %4183 = sst [smem:[#allocation42_spill]] %s4109_s2 }
   0x4   :  { %4184 = sst [smem:[#allocation43_spill]] %s4110_s3 }
   0x5   :  { %4185 = sst [smem:[#allocation44_spill]] %s4111_s4 }
   0x6   :  { %4186 = sst [smem:[#allocation45_spill]] %s4112_s5 }
   0x7   :  { %4187 = sst [smem:[#allocation46_spill]] %s4113_s6 }
   0x8   :  { %4188 = sst [smem:[#allocation47_spill]] %s4114_s7 }
   0x9   :  { %4189 = sst [smem:[#allocation48_spill]] %s4115_s8 }
   0xa   :  { %4190 = sst [smem:[#allocation49_spill]] %s4116_s9 }
   0xb   :  { %4191 = sst [smem:[#allocation50_spill]] %s4117_s10 }
   0xc   :  { %4192 = sst [smem:[#allocation51_spill]] %s4118_s11 }
   0xd   :  { %4193 = sst [smem:[#allocation52_spill]] %s4119_s12 }
   0xe   :  { %4194 = sst [smem:[#allocation53_spill]] %s4120_s13 }
   0xf   :  { %4195 = sst [smem:[#allocation54_spill]] %s4121_s14 }
  0x10   :  { %4196 = sst [smem:[#allocation55_spill]] %s4122_s15 }
  0x11   :  { %4197 = sst [smem:[#allocation56_spill]] %s4123_s16 }
  0x12   :  { %4198 = sst [smem:[#allocation57_spill]] %s4124_s17 }
  0x13   :  { %4199 = sst [smem:[#allocation58_spill]] %s4125_s18 }
  0x14   :  { %4200 = sst [smem:[#allocation59_spill]] %s4126_s19 }
  0x15   :  { %4201 = sst [smem:[#allocation60_spill]] %s4127_s20 }
  0x16   :  { %4202 = sst [smem:[#allocation61_spill]] %s4128_s21 }
  0x17   :  { %4203 = sst [smem:[#allocation62_spill]] %s4129_s22 }
  0x18   :  { %27 = vsyncpa [#allocation4], 0 }
  0x19   :  { %29 = vsyncpa [#allocation4 + $0x1], 0 }
  0x1a   :  { %30 = vsyncpa [#allocation7], 0 }
  0x1b   :  { %31 = vsyncpa [#allocation10], 0 }
  0x1c   :  { %33 = vsyncpa [#allocation10 + $0x1], 0 }
  0x1d   :  { %34 = vsyncpa [#allocation13], 0 }
  0x1e   :  { %36 = vsyncpa [#allocation13 + $0x1], 0 }
  0x1f   :  { %37 = vsyncpa [#allocation5], 0 }
  0x20   :  { %39 = vsyncpa [#allocation5 + $0x1], 0  ;;  %s3377_s3 = smov 0   ;;  %s3379_s28 = smov 0  }
  0x21   :  { %s3381_s29 = smov 0   ;;  %s3383_s30 = smov 0  }
  0x22   :  { %s3385_s4 = smov 0   ;;  %s3387_s0 = smov 0  }
  0x23   :  { %s3389_s23 = smov 0   ;;  %s3391_s1 = smov 0  }
  0x24   :  { %s3393_s5 = smov 0   ;;  %s3395_s24 = smov 0  }
  0x25   :  { %s3397_s6 = smov 0  }
  0x26 LB: > { %4204 = sst [smem:[#allocation21_spill]] %s3204_s28  ;;  %s3431_s25 = sadd.s32 4294967295, %s3240_s6   ;;  %s3240_s6 = sphi %s3397_s6, %s45_s6   ;;  %s3236_s24 = sphi %s3395_s24, %s4324_s24   ;;  %s3232_s5 = sphi %s3393_s5, %s4323_s5   ;;  %s3228_s1 = sphi %s3391_s1, %s4322_s1   ;;  %s3224_s23 = sphi %s3389_s23, %s4321_s23   ;;  %s3220_s0 = sphi %s3387_s0, %s4320_s0   ;;  %s3216_s4 = sphi %s3385_s4, %s4319_s4   ;;  %s3212_s30 = sphi %s3383_s30, %s4318_s30   ;;  %s3208_s29 = sphi %s3381_s29, %s4317_s29   ;;  %s3204_s28 = sphi %s3379_s28, %s4316_s28   ;;  %s3200_s3 = sphi %s3377_s3, %s4315_s3  }
  0x27   : > { %4205 = sst [smem:[#allocation22_spill]] %s3208_s29  ;;  %p197_p0 = scmp.ne.s32.totalorder %s3204_s28, %s3200_s3 }
  0x28   : > { %4206 = sst [smem:[#allocation23_spill]] %s3212_s30  ;;  %p4136_p1 = scmp.eq.s32.totalorder %s3431_s25, 0 }
  0x29   : > { %4207 = sst [smem:[#allocation24_spill]] %s3216_s4  ;;  %p2470_p3 = scmp.ge.s32.totalorder %s3240_s6, 1 }
  0x2a   : > { %4208 = sst [smem:[#allocation25_spill]] %s3220_s0  ;;  %p640_p4 = scmp.lt.s32.totalorder %s3240_s6, 5 }
  0x2b   : > { %4209 = sst [smem:[#allocation26_spill]] %s3224_s23  ;;  %p3440_p5 = por %p197_p0, %p4136_p1 }
  0x2c   : > { %4210 = sst [smem:[#allocation27_spill]] %s3228_s1  ;;  %p3444_p6 = pnand %p2470_p3, %p640_p4 }
  0x2d   : > { %4211 = sst [smem:[#allocation28_spill]] %s3232_s5  ;;  %s3242_s27 = smov [#allocation6]  }
  0x2e   : > { %4212 = sst [smem:[#allocation29_spill]] %s3236_s24  ;;  %s653_s22 = sshll.u32 %s3242_s27, 4  ;;  %s654_s22 = int_to_ptr.vmem [resolvable:$true] %s653_s22 }
  0x2f   : > { %4213 = sst [smem:[#allocation30_spill]] %s3240_s6  ;;  %p2723_p7 = pneg %p3444_p6 }
  0x30   : > { %s4214_s26 = scalar_select %p3440_p5, 1, 0 }
  0x31   : > { %s4216_s2 = scalar_select %p3444_p6, 1, 0 }
  0x32   : > { %4215 = sst [smem:[#allocation31_spill]] %s4214_s26  ;;  %p3452_p8 = pnand %p2723_p7, %p4136_p1 }
  0x33   : > { %4217 = sst [smem:[#allocation32_spill]] %s4216_s2  ;;  %s54_s21 = sadd.s32 1, %s3232_s5 }
  0x34   : > { %s4218_s3 = scalar_select %p3452_p8, 1, 0 }
  0x35   : > { %p3457_p9 = scmp.ge.s32.totalorder %s54_s21, 2  ;;  %s4220_s17 = sld [smem:[#allocation42_spill]] }
  0x36   : > { %p4146_p11 = pneg %p3452_p8 }
  0x37   : > { %s4219_s20 = scalar_select %p3457_p9, 1, 0 }
  0x3b   : > { %s2900_s16 = scalar_lea.hbm %s4220_s17, 16 }
  0x3c   : > { %p2901_p10 = scmp.ne.s32.totalorder %s4220_s17, %s2900_s16  ;;  %p2907_p0 = scmp.lt.u32.totalorder %s2900_s16, %s4220_s17 }
  0x3e   : > { %p2903_p12 = pnand %p4146_p11, %p2901_p10 }
  0x40   : > { %p2904_p13 = pneg %p2903_p12 }
  0x42   : > { %p2909_p3 = pnand %p2907_p0, %p2904_p13 }
  0x44   : > { %2912 = shalt.err (!%p2909_p3)
}
  0x45   : > { %s2913_s9 = scalar_lea.vmem %s654_s22, 16  ;;  %s2920_s13 = scalar_lea.vmem %s654_s22, 32 }
  0x46   : > { %p2914_p4 = scmp.ne.s32.totalorder %s654_s22, %s2913_s9  ;;  %p2921_p2 = scmp.lt.s32.totalorder %s654_s22, %s654_s22 }
  0x47   : > { %p2922_p5 = scmp.lt.s32.totalorder %s2920_s13, %s2913_s9 }
  0x48   : > { %p2916_p7 = pnand %p2914_p4, %p4146_p11 }
  0x49   : > { %p2923_p6 = por %p2922_p5, %p2921_p2 }
  0x4a   : > { %p2917_p1 = pneg %p2916_p7 }
  0x4c   : > { %p2924_p9 = pnand %p2923_p6, %p2917_p1 }
  0x4e   : > { %2927 = shalt.err (!%p2924_p9)
}
  0x4f   : > { %2726 = dma.hbm_to_vmem [thread:$0]  (!%p3452_p8), %s4220_s17, 16, %s654_s22, [#allocation7]  }
  0x50   : > { %p4221_p1 = scmp.ne.s32.totalorder %s4219_s20, 0  ;;  %p4145_p2 = scmp.eq.s32.totalorder %s3240_s6, 0 }
  0x51   : > { %s184_s9 = sadd.s32 1, %s3208_s29  ;;  %p191_p5 = scmp.ne.s32.totalorder %s3208_s29, %s3204_s28 }
  0x52   : > { %s4326_s21 = smov (%p4221_p1, %s54_s21), 0  ;;  %p4144_p9 = scmp.lt.s32.totalorder %s3240_s6, 4 }
  0x53   : > { %4222 = sst [smem:[#allocation33_spill]] %s4326_s21  ;;  %s181_s12 = ssub.s32 %s3232_s5, %s4326_s21 }
  0x54   : > { %p182_p6 = scmp.eq.s32.totalorder %s181_s12, 0  ;;  %p193_p10 = por %p191_p5, %p4145_p2 }
  0x55   : > { %s3501_s27 = sand.u32 1, %s3208_s29   ;;  %s4143_s22 = sshll.u32 %s3232_s5, 4 }
  0x56   : > { %s3498_s19 = scalar_select %p182_p6, %s3208_s29, %s184_s9  }
  0x57   : > { %s4224_s11 = sld [smem:[#allocation45_spill]]  ;;  %s716_s12 = scalar_lea.vmem [#allocation9], %s3501_s27 }
  0x58   : > { %4223 = sst [smem:[#allocation34_spill]] %s3498_s19  ;;  %s723_s21 = sshll.u32 %s716_s12, 4  ;;  %s3512_s21 = int_to_ptr.vmem [resolvable:$true] %s723_s21 }
  0x59   : > { %p3516_p12 = pnand %p4144_p9, %p193_p10  ;;  %s4226_s19 = sand.u32 1, %s3240_s6  }
  0x5a   : > { %s3523_s29 = scalar_lea.sflag [#allocation10], %s4226_s19 }
  0x5b   : > { %s4225_s9 = scalar_select %p3516_p12, 1, 0 }
  0x5c   : > { %p3529_p0 = pneg %p3516_p12 }
  0x5d   : > { %s3509_s17 = scalar_lea.hbm %s4224_s11, %s4143_s22  ;;  %s2933_s8 = scalar_lea.hbm %s4224_s11, 32 }
  0x5e   : > { %s2928_s13 = scalar_lea.hbm %s3509_s17, 16  ;;  %p2934_p7 = scmp.lt.u32.totalorder %s3509_s17, %s4224_s11 }
  0x5f   : > { %p2929_p13 = scmp.ne.s32.totalorder %s3509_s17, %s2928_s13  ;;  %p2935_p5 = scmp.lt.u32.totalorder %s2933_s8, %s2928_s13 }
  0x60   : > { %s4227_s18 = scalar_select %p3529_p0, 1, 0 }
  0x61   : > { %p2931_p3 = pnand %p3529_p0, %p2929_p13  ;;  %p2936_p6 = por %p2935_p5, %p2934_p7 }
  0x62   : > { %p2937_p10 = scmp.lt.u32.totalorder %s2928_s13, %s3509_s17 }
  0x63   : > { %p2932_p4 = pneg %p2931_p3 }
  0x64   : > { %p2938_p9 = por %p2937_p10, %p2936_p6 }
  0x66   : > { %p2939_p2 = pnand %p2938_p9, %p2932_p4 }
  0x68   : > { %2942 = shalt.err (!%p2939_p2)
}
  0x69   : > { %s2943_s19 = scalar_lea.vmem %s3512_s21, 16  ;;  %s3243_s22 = smov [#allocation9]  }
  0x6a   : > { %p2944_p13 = scmp.ne.s32.totalorder %s3512_s21, %s2943_s19  ;;  %s2948_s12 = sshll.u32 %s3243_s22, 4  ;;  %s2949_s12 = int_to_ptr.vmem [resolvable:$false] %s2948_s12 }
  0x6b   : > { %s2950_s7 = scalar_lea.vmem %s2949_s12, 32  ;;  %p2951_p1 = scmp.lt.s32.totalorder %s3512_s21, %s2949_s12 }
  0x6c   : > { %p2946_p3 = pnand %p2944_p13, %p3529_p0  ;;  %p2952_p8 = scmp.lt.s32.totalorder %s2950_s7, %s2943_s19 }
  0x6e   : > { %p2947_p11 = pneg %p2946_p3  ;;  %p2953_p7 = por %p2952_p8, %p2951_p1 }
  0x70   : > { %p2954_p5 = pnand %p2953_p7, %p2947_p11 }
  0x72   : > { %2957 = shalt.err (!%p2954_p5)
}
  0x73   : > { %2736 = dma.hbm_to_vmem [thread:$0]  (!%p3516_p12), %s3509_s17, 16, %s3512_s21, %s3523_s29  }
  0x74   : > { %s4228_s8 = sshll.u32 %s3501_s27, 4  ;;  %s4229_s22 = sshll.u32 %s3232_s5, 4 }
  0x75   : > { %s762_s16 = scalar_lea.vmem [#allocation11], %s4228_s8  ;;  %s4230_s15 = sld [smem:[#allocation55_spill]] }
  0x76   : > { %s769_s13 = sshll.u32 %s762_s16, 4  ;;  %s2550_s11 = sshll.u32 %s3232_s5, 8  ;;  %s3562_s13 = int_to_ptr.vmem [resolvable:$true] %s769_s13 }
  0x77   : > { %s4231_s10 = sld [smem:[#allocation50_spill]]  ;;  %s4232_s14 = sld [smem:[#allocation54_spill]] }
  0x78   : > { %s4233_s21 = smov %s4228_s8 }
  0x79   : > { %s801_s8 = scalar_lea.vmem [#allocation12], %s4233_s21 }
  0x7a   : > { %s808_s16 = sshll.u32 %s801_s8, 4  ;;  %s3577_s16 = int_to_ptr.vmem [resolvable:$true] %s808_s16 }
  0x7b   : > { %s3560_s7 = scalar_lea.hbm %s4230_s15, %s4229_s22  ;;  %s4234_s22 = sand.u32 1, %s3240_s6  }
  0x7c   : > { %s3581_s19 = scalar_lea.sflag [#allocation13], %s4234_s22 }
  0x7d   : > { %s3568_s26 = scalar_lea.hbm %s4231_s10, %s2550_s11  ;;  %s3573_s17 = scalar_lea.hbm %s4232_s14, %s2550_s11 }
  0x7e   : > { %s2958_s23 = scalar_lea.hbm %s3573_s17, 256  ;;  %s2963_s2 = scalar_lea.hbm %s4232_s14, 512 }
  0x7f   : > { %p2959_p8 = scmp.ne.s32.totalorder %s3573_s17, %s2958_s23  ;;  %p2964_p2 = scmp.lt.u32.totalorder %s3573_s17, %s4232_s14 }
  0x80   : > { %p2965_p9 = scmp.lt.u32.totalorder %s2963_s2, %s2958_s23  ;;  %p2967_p6 = scmp.lt.u32.totalorder %s2958_s23, %s3573_s17 }
  0x81   : > { %p2961_p11 = pnand %p2959_p8, %p3529_p0 }
  0x82   : > { %p2966_p4 = por %p2965_p9, %p2964_p2 }
  0x83   : > { %p2962_p1 = pneg %p2961_p11 }
  0x84   : > { %p2968_p10 = por %p2967_p6, %p2966_p4 }
  0x86   : > { %p2969_p13 = pnand %p2968_p10, %p2962_p1 }
  0x88   : > { %2972 = shalt.err (!%p2969_p13)
}
  0x89   : > { %s2973_s21 = scalar_lea.vmem %s3577_s16, 256  ;;  %s3244_s8 = smov [#allocation12]  }
  0x8a   : > { %p2974_p3 = scmp.ne.s32.totalorder %s3577_s16, %s2973_s21  ;;  %s2978_s22 = sshll.u32 %s3244_s8, 4  ;;  %s2979_s22 = int_to_ptr.vmem [resolvable:$false] %s2978_s22 }
  0x8b   : > { %s2980_s28 = scalar_lea.vmem %s2979_s22, 512  ;;  %p2981_p8 = scmp.lt.s32.totalorder %s3577_s16, %s2979_s22 }
  0x8c   : > { %p2976_p7 = pnand %p2974_p3, %p3529_p0  ;;  %p2982_p11 = scmp.lt.s32.totalorder %s2980_s28, %s2973_s21 }
  0x8e   : > { %p2977_p5 = pneg %p2976_p7  ;;  %p2983_p2 = por %p2982_p11, %p2981_p8 }
  0x90   : > { %p2984_p9 = pnand %p2983_p2, %p2977_p5 }
  0x92   : > { %2987 = shalt.err (!%p2984_p9)
}
  0x93   : > { %s4162_s23 = smov 64   ;;  %s4163_s1 = smov 4  }
  0x94   : > { %2742 = dma.hbm_to_vmem [thread:$0]  (!%p3516_p12), %s3573_s17, 256, %s3577_s16, %s3581_s19, %s4162_s23, %s4162_s23, %s4163_s1  }
  0x95   : > { %s3247_s2 = smov [#allocation8]   ;;  %s4235_s8 = sld [smem:[#allocation43_spill]] }
  0x96   : > { %s664_s11 = sshll.u32 %s3247_s2, 4  ;;  %p4236_p4 = scmp.ne.s32.totalorder %s4218_s3, 0  ;;  %s665_s11 = int_to_ptr.vmem [resolvable:$true] %s664_s11 }
  0x98   : > { %p4237_p6 = pneg %p4236_p4 }
  0x9b   : > { %s2988_s22 = scalar_lea.hbm %s4235_s8, 16 }
  0x9c   : > { %p2989_p1 = scmp.ne.s32.totalorder %s4235_s8, %s2988_s22  ;;  %p2995_p3 = scmp.lt.u32.totalorder %s2988_s22, %s4235_s8 }
  0x9e   : > { %p2991_p10 = pnand %p2989_p1, %p4237_p6 }
  0xa0   : > { %p2992_p13 = pneg %p2991_p10 }
  0xa2   : > { %p2997_p7 = pnand %p2995_p3, %p2992_p13 }
  0xa4   : > { %3000 = shalt.err (!%p2997_p7)
}
  0xa5   : > { %s3001_s17 = scalar_lea.vmem %s665_s11, 16  ;;  %p4238_p8 = pmov %p4237_p6 }
  0xa6   : > { %p3002_p5 = scmp.ne.s32.totalorder %s665_s11, %s3001_s17  ;;  %s3008_s16 = scalar_lea.vmem %s665_s11, 32 }
  0xa7   : > { %p3009_p9 = scmp.lt.s32.totalorder %s665_s11, %s665_s11  ;;  %p3010_p12 = scmp.lt.s32.totalorder %s3008_s16, %s3001_s17 }
  0xa8   : > { %p3004_p11 = pnand %p3002_p5, %p4238_p8 }
  0xa9   : > { %p3011_p0 = por %p3010_p12, %p3009_p9 }
  0xaa   : > { %p3005_p2 = pneg %p3004_p11 }
  0xac   : > { %p3012_p1 = pnand %p3011_p0, %p3005_p2 }
  0xae   : > { %3015 = shalt.err (!%p3012_p1)
}
  0xaf   : > { %2729 = dma.hbm_to_vmem [thread:$0]  (!%p4236_p4), %s4235_s8, 16, %s665_s11, [#allocation7]  }
  0xb0   : > { %s2469_s5 = sadd.s32 4294967294, %s3240_s6   ;;  %s57_s3 = sadd.s32 1, %s3236_s24 }
  0xb1   : > { %p4239_p12 = scmp.ne.s32.totalorder %s4219_s20, 0  ;;  %s64_s2 = sadd.s32 1, %s3220_s0 }
  0xb2   : > { %p71_p0 = scmp.ne.s32.totalorder %s3220_s0, %s3216_s4  ;;  %p77_p10 = scmp.ne.s32.totalorder %s3216_s4, %s3212_s30 }
  0xb3   : > { %s4328_s3 = smov (!%p4239_p12, %s57_s3), %s3236_s24  ;;  %p4240_p13 = scmp.eq.s32.totalorder %s3240_s6, 0 }
  0xb4   : > { %p59_p6 = scmp.ge.s32.totalorder %s4328_s3, 2  ;;  %p4242_p7 = scmp.eq.s32.totalorder %s3431_s25, 3 }
  0xb5   : > { %p3640_p3 = por %p4240_p13, %p71_p0  ;;  %p4246_p5 = scmp.eq.s32.totalorder %s3431_s25, 0 }
  0xb6   : > { %p3646_p4 = por %p4242_p7, %p71_p0  ;;  %s4330_s3 = smov (%p59_p6, %s4328_s3), 0 }
  0xb7   : > { %4245 = sst [smem:[#allocation36_spill]] %s4330_s3  ;;  %p3654_p8 = por %p4246_p5, %p77_p10 }
  0xb8   : > { %s4243_s11 = scalar_select %p3646_p4, 1, 0 }
  0xb9   : > { %s4247_s20 = scalar_select %p3654_p8, 1, 0 }
  0xba   : > { %4244 = sst [smem:[#allocation35_spill]] %s4243_s11  ;;  %p633_p11 = scmp.eq.s32.totalorder %s2469_s5, 3 }
  0xbb   : > { %s61_s21 = ssub.s32 %s3236_s24, %s4330_s3  ;;  %s4167_s22 = sand.u32 1, %s3220_s0  }
  0xbc   : > { %p62_p2 = scmp.eq.s32.totalorder %s61_s21, 0  ;;  %p3661_p9 = por %p633_p11, %p77_p10 }
  0xbd   : > { %s2474_s17 = sshll.u32 %s4167_s22, 3  ;;  %s2475_s14 = sshll.u32 %s3236_s24, 7 }
  0xbe   : > { %s4248_s28 = scalar_select %p3661_p9, 1, 0 }
  0xbf   : > { %s3668_s16 = scalar_select %p62_p2, %s3220_s0, %s64_s2  }
  0xc0   : > { %4249 = sst [smem:[#allocation37_spill]] %s4248_s28  ;;  %s685_s5 = scalar_lea.vmem [#allocation3], %s2474_s17 }
  0xc1   : > { %4250 = sst [smem:[#allocation38_spill]] %s3668_s16  ;;  %s692_s3 = sshll.u32 %s685_s5, 4  ;;  %s3676_s3 = int_to_ptr.vmem [resolvable:$true] %s692_s3 }
  0xc2   : > { %s4251_s1 = sld [smem:[#allocation40_spill]]  ;;  %p4253_p1 = scmp.lt.s32.totalorder %s3240_s6, 4 }
  0xc3   : > { %s3016_s22 = scalar_lea.hbm %s3568_s26, 256  ;;  %p4255_p6 = scmp.ne.s32.totalorder %s4227_s18, 0 }
  0xc4   : > { %p3682_p12 = pnand %p4253_p1, %p3640_p3  ;;  %p3017_p0 = scmp.ne.s32.totalorder %s3568_s26, %s3016_s22 }
  0xc5   : > { %s3021_s23 = scalar_lea.hbm %s4231_s10, 512  ;;  %p3022_p7 = scmp.lt.u32.totalorder %s3568_s26, %s4231_s10 }
  0xc6   : > { %p3019_p10 = pnand %p3017_p0, %p4255_p6  ;;  %p3023_p5 = scmp.lt.u32.totalorder %s3021_s23, %s3016_s22 }
  0xc7   : > { %p3025_p2 = scmp.lt.u32.totalorder %s3016_s22, %s3568_s26 }
  0xc8   : > { %s4252_s8 = smov %s4251_s1  ;;  %s3674_s30 = scalar_lea.hbm %s4251_s1, %s2475_s14 }
  0xc9   : > { %p3020_p13 = pneg %p3019_p10  ;;  %p3024_p11 = por %p3023_p5, %p3022_p7 }
  0xcb   : > { %p3026_p3 = por %p3025_p2, %p3024_p11 }
  0xcd   : > { %p3027_p1 = pnand %p3026_p3, %p3020_p13 }
  0xcf   : > { %3030 = shalt.err (!%p3027_p1)
}
  0xd0   : > { %s3031_s12 = scalar_lea.vmem %s3562_s13, 256  ;;  %s3248_s24 = smov [#allocation11]  }
  0xd1   : > { %p3032_p0 = scmp.ne.s32.totalorder %s3562_s13, %s3031_s12  ;;  %s3036_s14 = sshll.u32 %s3248_s24, 4  ;;  %s3037_s14 = int_to_ptr.vmem [resolvable:$false] %s3036_s14 }
  0xd2   : > { %s3038_s15 = scalar_lea.vmem %s3037_s14, 512  ;;  %p3039_p4 = scmp.lt.s32.totalorder %s3562_s13, %s3037_s14 }
  0xd3   : > { %p3034_p10 = pnand %p3032_p0, %p4255_p6  ;;  %p3040_p8 = scmp.lt.s32.totalorder %s3038_s15, %s3031_s12 }
  0xd5   : > { %p3035_p9 = pneg %p3034_p10  ;;  %p3041_p7 = por %p3040_p8, %p3039_p4 }
  0xd7   : > { %p3042_p5 = pnand %p3041_p7, %p3035_p9 }
  0xd9   : > { %3045 = shalt.err (!%p3042_p5)
}
  0xda   : > { %p4256_p13 = scmp.ne.s32.totalorder %s4225_s9, 0  ;;  %s4257_s22 = smov 4  }
  0xdb   : > { %s4258_s5 = smov 64   ;;  %s4259_s2 = sand.u32 1, %s3220_s0  }
  0xdc   : > { %2739 = dma.hbm_to_vmem [thread:$0]  (!%p4256_p13), %s3568_s26, 256, %s3562_s13, %s3523_s29, %s4258_s5, %s4258_s5, %s4257_s22  }
  0xdd   : > { %s682_s23 = scalar_lea.sflag [#allocation4], %s4259_s2  ;;  %s3046_s1 = scalar_lea.hbm %s3674_s30, 128 }
  0xde   : > { %p3047_p4 = scmp.ne.s32.totalorder %s3674_s30, %s3046_s1  ;;  %p3048_p8 = pneg %p3682_p12 }
  0xdf   : > { %s3051_s24 = scalar_lea.hbm %s4252_s8, 256  ;;  %p3052_p2 = scmp.lt.u32.totalorder %s3674_s30, %s4252_s8 }
  0xe0   : > { %p3049_p9 = pnand %p3048_p8, %p3047_p4  ;;  %p3053_p3 = scmp.lt.u32.totalorder %s3051_s24, %s3046_s1 }
  0xe1   : > { %p3055_p0 = scmp.lt.u32.totalorder %s3046_s1, %s3674_s30 }
  0xe2   : > { %p3050_p11 = pneg %p3049_p9  ;;  %p3054_p1 = por %p3053_p3, %p3052_p2 }
  0xe4   : > { %p3056_p10 = por %p3055_p0, %p3054_p1 }
  0xe6   : > { %p3057_p7 = pnand %p3056_p10, %p3050_p11 }
  0xe8   : > { %3060 = shalt.err (!%p3057_p7)
}
  0xe9   : > { %s3061_s29 = scalar_lea.vmem %s3676_s3, 128  ;;  %s3249_s26 = smov [#allocation3]  }
  0xea   : > { %p3062_p5 = scmp.ne.s32.totalorder %s3676_s3, %s3061_s29  ;;  %s3066_s13 = sshll.u32 %s3249_s26, 4  ;;  %s3067_s13 = int_to_ptr.vmem [resolvable:$false] %s3066_s13 }
  0xeb   : > { %s3068_s22 = scalar_lea.vmem %s3067_s13, 256  ;;  %p3069_p13 = scmp.lt.s32.totalorder %s3676_s3, %s3067_s13 }
  0xec   : > { %p3064_p4 = pnand %p3062_p5, %p3048_p8  ;;  %p3070_p2 = scmp.lt.s32.totalorder %s3068_s22, %s3061_s29 }
  0xee   : > { %p3065_p9 = pneg %p3064_p4  ;;  %p3071_p3 = por %p3070_p2, %p3069_p13 }
  0xf0   : > { %p3072_p1 = pnand %p3071_p3, %p3065_p9 }
  0xf2   : > { %3075 = shalt.err (!%p3072_p1)
}
  0xf3   : > { %2733 = dma.hbm_to_vmem [thread:$0]  (!%p3682_p12), %s3674_s30, 128, %s3676_s3, %s682_s23  }
  0xf4   : > { %s821_s5 = scalar_lea.vmem [#allocation14], %s3501_s27  ;;  %s3076_s1 = scalar_lea.hbm %s3560_s7, 16 }
  0xf5   : > { %s828_s2 = sshll.u32 %s821_s5, 4  ;;  %p3077_p8 = scmp.ne.s32.totalorder %s3560_s7, %s3076_s1  ;;  %s829_s2 = int_to_ptr.vmem [resolvable:$true] %s828_s2 }
  0xf6   : > { %s4260_s21 = sld [smem:[#allocation55_spill]]  ;;  %p3085_p5 = scmp.lt.u32.totalorder %s3076_s1, %s3560_s7 }
  0xf7   : > { %p3079_p13 = pnand %p3077_p8, %p4255_p6 }
  0xf9   : > { %p3080_p11 = pneg %p3079_p13 }
  0xfc   : > { %s3081_s24 = scalar_lea.hbm %s4260_s21, 32  ;;  %p3082_p0 = scmp.lt.u32.totalorder %s3560_s7, %s4260_s21 }
  0xfd   : > { %p3083_p10 = scmp.lt.u32.totalorder %s3081_s24, %s3076_s1 }
  0xff   : > { %p3084_p7 = por %p3083_p10, %p3082_p0 }
 0x101   : > { %p3086_p12 = por %p3085_p5, %p3084_p7 }
 0x103   : > { %p3087_p4 = pnand %p3086_p12, %p3080_p11 }
 0x105   : > { %3090 = shalt.err (!%p3087_p4)
}
 0x106   : > { %s3091_s30 = scalar_lea.vmem %s829_s2, 16  ;;  %s3250_s27 = smov [#allocation14]  }
 0x107   : > { %p3092_p9 = scmp.ne.s32.totalorder %s829_s2, %s3091_s30  ;;  %s3096_s3 = sshll.u32 %s3250_s27, 4  ;;  %s3097_s3 = int_to_ptr.vmem [resolvable:$false] %s3096_s3 }
 0x108   : > { %s3098_s23 = scalar_lea.vmem %s3097_s3, 32  ;;  %p3099_p1 = scmp.lt.s32.totalorder %s829_s2, %s3097_s3 }
 0x109   : > { %p3094_p2 = pnand %p3092_p9, %p4255_p6  ;;  %p3100_p8 = scmp.lt.s32.totalorder %s3098_s23, %s3091_s30 }
 0x10b   : > { %p3095_p3 = pneg %p3094_p2  ;;  %p3101_p13 = por %p3100_p8, %p3099_p1 }
 0x10d   : > { %p3102_p0 = pnand %p3101_p13, %p3095_p3 }
 0x10f   : > { %3105 = shalt.err (!%p3102_p0)
}
 0x110   : > { %p4261_p10 = scmp.ne.s32.totalorder %s4225_s9, 0  ;;  %s4262_s29 = sld [smem:[#allocation32_spill]] }
 0x112   : > { %2745 = dma.hbm_to_vmem [thread:$0]  (!%p4261_p10), %s3560_s7, 16, %s829_s2, %s3581_s19  }
 0x116   : > { %p4263_p11 = scmp.ne.s32.totalorder %s4262_s29, 0 }
 0x118   : > { %863 = sbr.rel (%p4263_p11) target bundleno = 3412 (0xd54), region = 108 }
 0x11f   : > { %s3760_s18 = sand.u32 1, %s3216_s4   ;;  %p4264_p6 = scmp.ne.s32.totalorder %s4247_s20, 0 }
 0x120   : > { %s4171_s26 = sshll.u32 %s3760_s18, 3  ;;  %s866_s13 = scalar_lea.sflag [#allocation4], %s3760_s18 }
 0x121   : > { %s3766_s22 = scalar_lea.vmem [#allocation3], %s4171_s26 }
 0x122   : > { %3179 = dma.done.wait (%p4264_p6), %s866_s13, 128  }
 0x123   : > { %3181 = vsyncadd (%p4264_p6), %s866_s13, 4294967168  ;;  %p4265_p7 = scmp.eq.s32.totalorder %s3431_s25, 0 }
 0x125   : > { %3183 = dma.done.wait (%p4265_p7), [#allocation7], 32   ;;  %p4266_p5 = pmov %p4265_p7 }
 0x126   : > { %s4267_s9 = sld [smem:[#allocation21_spill]]  ;;  %s4268_s7 = sld [smem:[#allocation31_spill]] }
 0x127   : > { %3185 = vsyncadd (%p4266_p5), [#allocation7], 4294967264  ;;  %s882_s19 = sand.u32 1, %s3431_s25  }
 0x128   : > { %s883_s2 = scalar_lea.sflag [#allocation10], %s882_s19 }
 0x12c   : > { %s3778_s5 = sand.u32 1, %s4267_s9   ;;  %p4269_p12 = scmp.ne.s32.totalorder %s4268_s7, 0 }
 0x12e   : > { %3187 = dma.done.wait (%p4269_p12), %s883_s2, 272  }
 0x12f   : > { %3189 = vsyncadd (%p4269_p12), %s883_s2, 4294967024  ;;  %s2488_s20 = sshll.u32 %s3778_s5, 4  ;;  %s900_s12 = scalar_lea.sflag [#allocation13], %s882_s19 }
 0x130   : > { %s3786_s17 = scalar_lea.vmem [#allocation11], %s2488_s20  ;;  %s3788_s21 = scalar_lea.vmem [#allocation12], %s2488_s20 }
 0x131   : > { %4270 = sst [smem:[#allocation39_spill]] %s3788_s21 }
 0x132   : > { %3191 = dma.done.wait (%p4269_p12), %s900_s12, 272  }
 0x133   : > { %3193 = vsyncadd (%p4269_p12), %s900_s12, 4294967024  ;;  %s4271_s25 = sld [smem:[#allocation27_spill]]  ;;  %s4272_s24 = sld [smem:[#allocation26_spill]] }
 0x134   : > { %s4275_s20 = sld [smem:[#allocation44_spill]]  ;;  %s4276_s1 = sld [smem:[#allocation46_spill]] }
 0x135   : > { %s4277_s16 = sld [smem:[#allocation48_spill]]  ;;  %s4281_s30 = sld [smem:[#allocation53_spill]] }
 0x136   : > { %s4283_s3 = sld [smem:[#allocation57_spill]]  ;;  %s4284_s9 = sld [smem:[#allocation58_spill]] }
 0x137   : > { %s911_s15 = scalar_lea.vmem [#allocation14], %s3778_s5 }
 0x139   : > { %p1037_p4 = scmp.lt.s32.totalorder %s4271_s25, 1  ;;  %p1040_p9 = scmp.lt.s32.totalorder %s4272_s24, 1 }
 0x13a   : > { %p2499_p2 = scmp.ne.s32.totalorder %s4272_s24, 0 }
 0x13b   : > { %s4332_s25 = smov (!%p1037_p4, %s4271_s25), 1  ;;  %v1089_v0 = vld [vmem:[%s3766_s22] sm:$0xff] (!%p2499_p2)  ;;  %vm1092_vm0 = vcmask (!%p2499_p2), 261120   ;;  %v2500_v11 = vld [vmem:[#allocation6] ss:$0 sm:$0xff] (!%p2499_p2) }
 0x13c   : > { %s3800_s14 = scalar_select %p1040_p9, %s4272_s24, 1 }
 0x13d   : > { %v1093_v1 = vsel (!%p2499_p2), %vm1092_vm0, %v1089_v0, 0.0  ;;  %v2501_v13 = vld [vmem:[#allocation8] ss:$0 sm:$0xff] (!%p2499_p2) }
 0x13e   : > { %s2552_s23 = sshll.u32 %s3800_s14, 4  ;;  %s1069_s11 = scalar_lea.vmem %s4281_s30, %s3800_s14  ;;  %1094 = vadd.xlane.f32.xlu0 (!%p2499_p2), %v1093_v1 }
 0x13f   : > { %s3814_s12 = scalar_lea.vmem %s4275_s20, %s2552_s23  ;;  %s3819_s26 = scalar_lea.vmem %s4276_s1, %s2552_s23 }
 0x140   : > { %s3824_s27 = scalar_lea.vmem %s4277_s16, %s2552_s23  ;;  %s2555_s21 = sshll.u32 %s3800_s14, 5 }
 0x141   : > { %s4282_s16 = sld [smem:[#allocation56_spill]]  ;;  %s1077_s29 = scalar_lea.vmem %s4283_s3, %s3800_s14 }
 0x142   : > { %s1080_s19 = scalar_lea.vmem %s4284_s9, %s3800_s14  ;;  %s4285_s20 = sld [smem:[#allocation59_spill]] }
 0x143   : > { %s4286_s1 = sshll.u32 %s3760_s18, 3  ;;  %1088 = sbr.rel (%p2499_p2) target bundleno = 631 (0x277), region = 140 }
 0x144   : > { %s3863_s30 = scalar_lea.vmem [#allocation15], %s4286_s1 }
 0x147   : > { %s3846_s23 = scalar_lea.vmem %s4282_s16, %s2555_s21 }
 0x148   : > { %s1083_s6 = scalar_lea.vmem %s4285_s20, %s3800_s14 }
 0x1cb   : > { %v1095_v2 = vpop.xlane.xlu0 %1094 }
 0x1cc   : > { %v1097_v3 = vmul.f32 0.03125, %v1095_v2 }
 0x1ce   : > { %v1098_v4 = vsub.f32 %v1089_v0, %v1097_v3 }
 0x1d0   : > { %v1099_v5 = vmul.f32 %v1098_v4, %v1098_v4 }
 0x1d2   : > { %v1100_v6 = vsel %vm1092_vm0, %v1099_v5, 0.0 }
 0x1d3   : > { %1101 = vadd.xlane.f32.xlu0 %v1100_v6 }
 0x260   : > { %v1102_v7 = vpop.xlane.xlu0 %1101 }
 0x261   : > { %v1103_v8 = vmul.f32 0.03125, %v1102_v7 }
 0x263   : > { %v1104_v9 = vadd.f32 1e-12, %v1103_v8 }
 0x265   : > { %2858 = vrsqrt.f32 %v1104_v9 }
 0x26f   : > { %v2859_v10 = vpop.eup %2858 }
 0x270   : > { %v1106_v12 = vmul.f32 %v2859_v10, %v1098_v4 }
 0x272   : > { %v1113_v14 = vmul.f32 %v2500_v11, %v1106_v12 }
 0x274   : > { %v1120_v15 = vadd.f32 %v2501_v13, %v1113_v14 }
 0x276   : > { %1121 = vst.msk [vmem:[#allocation2] sm:$0xff] %vm1092_vm0, %v1120_v15 }
 0x277 PF: > { %v2860_v16 = vld [vmem:[%s3819_s26] sm:$0xff]   ;;  %v3251_v17 = vmov 0.0   ;;  %v2862_v19 = vld [vmem:[%s3819_s26 + $0x8] sm:$0xff]   ;;  %vm3252_vm1 = vmmov 0   ;;  %vm1148_vm2 = vcmask 261120   ;;  %s4287_s21 = sld [smem:[#allocation47_spill]] }
 0x278   : > { %2603 = vmatprep.subr.bf16.mxu1 %v3251_v17  ;;  %2595 = vmatprep.subr.bf16.mxu0 %v3251_v17  ;;  %v2861_v18 = vld [vmem:[%s3814_s12] sm:$0xff]   ;;  %v2863_v21 = vld [vmem:[%s3814_s12 + $0x8] sm:$0xff]   ;;  %s4289_s12 = scalar_lea.vmem [#allocation9], %s3778_s5  ;;  %vm1327_vm3 = vcmask 64512   ;;  %s3253_s10 = smov 112   ;;  %vm1389_vm4 = vcmask 1043456  }
 0x279   : > { %2604 = vmatpush3.bf16.msra.mxu1 %v2860_v16  ;;  %2607 = vmatprep.mubr.msk.bf16.mxu1 %vm3252_vm1, %v3251_v17  ;;  %v2502_v24 = vld [vmem:[%s4289_s12] ss:$0 sm:$0xff]  ;;  %s3254_s8 = smov 120   ;;  %s3255_s16 = smov 104   ;;  %v2865_v39 = vld [vmem:[%s3824_s27 + $0x8] sm:$0xff]   ;;  %vm1779_vm5 = vcmask 130048  }
 0x27a   : > { %2605 = vmatprep.subr.bf16.mxu1 %v3251_v17  ;;  %2596 = vmatpush3.bf16.msra.mxu0 %v2861_v18  ;;  %v2864_v38 = vld [vmem:[%s3824_s27] sm:$0xff]   ;;  %s4290_s4 = sld [smem:[#allocation41_spill]]  ;;  %s3257_s28 = smov 16   ;;  %vm1781_vm6 = vcmask 195584   ;;  %vm1997_vm7 = vcmask 523264  }
 0x27b   : > { %2597 = vmatprep.subr.bf16.mxu0 %v3251_v17  ;;  %2599 = vmatprep.mubr.msk.bf16.mxu0 %vm3252_vm1, %v3251_v17  ;;  %s4292_s9 = sld [smem:[#allocation49_spill]]  ;;  %s3258_s20 = smov 24  }
 0x27c   : > { %s4294_s26 = sld [smem:[#allocation51_spill]] }
 0x27d   : > { %v3878_v20 = vld [vmem:[#allocation2] sm:$0xff]  ;;  %2606 = vmatpush3.bf16.msra.mxu1 %v2862_v19  ;;  %s4288_s24 = scalar_lea.vmem %s4287_s21, %s3800_s14  ;;  %s4296_s21 = sld [smem:[#allocation39_spill]] }
 0x27e   : > { %v1128_v22 = vpack.c.bf16 %v3878_v20, %v3878_v20  ;;  %2598 = vmatpush3.bf16.msra.mxu0 %v2863_v21  ;;  %2619 = vmatprep.subr.bf16.mxu1 %v3251_v17  ;;  %v2506_v23 = vld [vmem:[%s4288_s24] ss:$0 sm:$0xff] }
 0x27f   : > { %2611 = vmatprep.subr.bf16.mxu0 %v3251_v17 }
 0x280   : > { %2608 = vmatmul.mubr.msk.bf16.vlgmr.msra.gmra.mrb[0].mxu1 %vm1148_vm2, %v1128_v22  ;;  %s4291_s3 = scalar_lea.vmem %s4290_s4, %s4332_s25  ;;  %s3256_s25 = smov 8  }
 0x281   : > { %2600 = vmatmul.mubr.msk.bf16.vlgmr.msra.gmra.mrb[0].mxu0 %vm1148_vm2, %v1128_v22  ;;  %2621 = vmatprep.mubr.msk.bf16.mxu1 %vm3252_vm1, %v3251_v17  ;;  %v2514_v49 = vld [vmem:[%s4291_s3] ss:$0 sm:$0xff]  ;;  %s4293_s2 = scalar_lea.vmem %s4292_s9, %s3800_s14  ;;  %s4303_s9 = sld [smem:[#allocation26_spill]] }
 0x282   : > { %2615 = vmatprep.mubr.msk.bf16.mxu0 %vm3252_vm1, %v3251_v17  ;;  %2612 = vmatpush3.bf16.msra.mxu0 %v2864_v38  ;;  %v2510_v56 = vld [vmem:[%s4293_s2] ss:$0 sm:$0xff]  ;;  %s4295_s22 = scalar_lea.vmem %s4294_s26, %s3800_s14 }
 0x283   : > { %2613 = vmatprep.subr.bf16.mxu0 %v3251_v17 }
 0x286   : > { %2614 = vmatpush3.bf16.msra.mxu0 %v2865_v39 }
 0x287   : > { %2625 = vmatprep.subr.bf16.mxu0 %v3251_v17  ;;  %p2541_p3 = scmp.ne.s32.totalorder %s4303_s9, 1 }
 0x288   : > { %vm3260_vm8 = vmmov (!%p2541_p3), 0   ;;  %s4306_s1 = sld [smem:[#allocation61_spill]] (!%p2541_p3) }
 0x289   : > { %2616 = vmatmul.mubr.msk.bf16.vlgmr.msra.gmra.mrb[4].mxu0 %vm1148_vm2, %v1128_v22 }
 0x28a   : > { %2627 = vmatprep.mubr.msk.bf16.mxu0 %vm3252_vm1, %v3251_v17 }
 0x353   : > { %v1249_v25 = vpop.f32.mrb[0].mxu1 }
 0x354   : > { %v1250_v26 = vadd.f32 %v2506_v23, %v1249_v25  ;;  %v2609_v27 = vpop.f32.mrb[1].mxu1  ;;  %v1186_v28 = vpop.f32.mrb[0].mxu0 }
 0x355   : > { %v1252_v29 = vpop.f32.mrb[2].mxu1  ;;  %v1187_v30 = vadd.f32 %v2502_v24, %v1186_v28  ;;  %v2601_v31 = vpop.f32.mrb[1].mxu0 }
 0x356   : > { %v1319_v32 = vpack.c.bf16 %v1250_v26, %v1250_v26  ;;  %v2610_v33 = vpop.f32.mrb[3].mxu1  ;;  %v1189_v34 = vpop.f32.mrb[2].mxu0 }
 0x357   : > { %v2602_v35 = vpop.f32.mrb[3].mxu0  ;;  %v1318_v36 = vpack.c.bf16 %v1187_v30, %v1187_v30 }
 0x358   : > { %1548 = vrot.lane.b32.xlu1 %v1319_v32, %s3253_s10  ;;  %1437 = vrot.lane.b32.xlu0 %v1319_v32, %s3254_s8  ;;  %v1332_v37 = vsel %vm1327_vm3, %v1319_v32, 0 }
 0x359   : > { %2620 = vmatpush3.bf16.xpose.msra.mxu1 %v1332_v37 }
 0x35a   : > { %2631 = vmatprep.subr.bf16.mxu1 %v3251_v17 }
 0x35c   : > { %1546 = vrot.lane.b32.xlu1 %v1318_v36, %s3253_s10  ;;  %1434 = vrot.lane.b32.xlu0 %v1318_v36, %s3254_s8  ;;  %v1312_v57 = vpop.f32.mrb[4].mxu0 }
 0x35d   : > { %v1313_v58 = vadd.f32 %v2510_v56, %v1312_v57  ;;  %v2617_v59 = vpop.f32.mrb[5].mxu0 }
 0x35e   : > { %v1315_v60 = vpop.f32.mrb[6].mxu0 }
 0x35f   : > { %v1320_v61 = vpack.c.bf16 %v1313_v58, %v1313_v58  ;;  %v2618_v62 = vpop.f32.mrb[7].mxu0 }
 0x360   : > { %1656 = vrot.lane.b32.xlu1 %v1318_v36, %s3255_s16  ;;  %1658 = vrot.lane.b32.xlu0 %v1319_v32, %s3255_s16 }
 0x361   : > { %2622 = vmatmul.mubr.msk.bf16.vlgmr.msra.gmra.mrb[4].mxu1 %vm1327_vm3, %v1318_v36  ;;  %v1391_v63 = vsel %vm1389_vm4, %v1320_v61, 0 }
 0x362   : > { %2633 = vmatprep.mubr.msk.bf16.mxu1 %vm3252_vm1, %v3251_v17  ;;  %2626 = vmatpush3.bf16.msra.mxu0 %v1391_v63 }
 0x363   : > { %2637 = vmatprep.subr.bf16.mxu0 %v3251_v17 }
 0x3ca   : > { %v1438_v40 = vpop.permute.xlu0 %1437  ;;  %v1549_v42 = vpop.permute.xlu1 %1548 }
 0x3cb   : > { %v1443_v41 = vsel %vm1327_vm3, %v1438_v40, 0  ;;  %v1554_v44 = vsel %vm1327_vm3, %v1549_v42, 0 }
 0x3cc   : > { %2632 = vmatpush3.bf16.xpose.msra.mxu1 %v1443_v41 }
 0x3cd   : > { %2643 = vmatprep.subr.bf16.mxu1 %v3251_v17 }
 0x3ce   : > { %v1435_v43 = vpop.permute.xlu0 %1434  ;;  %v1547_v46 = vpop.permute.xlu1 %1546 }
 0x3d2   : > { %v1659_v45 = vpop.permute.xlu0 %1658  ;;  %v1657_v48 = vpop.permute.xlu1 %1656 }
 0x3d3   : > { %2634 = vmatmul.mubr.msk.bf16.vlgmr.msra.gmra.mrb[8].mxu1 %vm1327_vm3, %v1435_v43  ;;  %v1664_v47 = vsel %vm1327_vm3, %v1659_v45, 0 }
 0x3d4   : > { %2644 = vmatpush3.bf16.xpose.msra.mxu1 %v1554_v44  ;;  %2645 = vmatprep.mubr.msk.bf16.mxu1 %vm3252_vm1, %v3251_v17 }
 0x3d5   : > { %2655 = vmatprep.subr.bf16.mxu1 %v3251_v17 }
 0x3db   : > { %2646 = vmatmul.mubr.msk.bf16.vlgmr.msra.gmra.mrb[12].mxu1 %vm1327_vm3, %v1547_v46 }
 0x3dc   : > { %2656 = vmatpush3.bf16.xpose.msra.mxu1 %v1664_v47  ;;  %2657 = vmatprep.mubr.msk.bf16.mxu1 %vm3252_vm1, %v3251_v17 }
 0x3dd   : > { %2667 = vmatprep.subr.bf16.mxu1 %v3251_v17 }
 0x3e3   : > { %2658 = vmatmul.mubr.msk.bf16.vlgmr.msra.gmra.mrb[16].mxu1 %vm1327_vm3, %v1657_v48 }
 0x3e4   : > { %2671 = vmatprep.mubr.msk.bf16.mxu1 %vm3252_vm1, %v3251_v17 }
 0x434   : > { %v1368_v50 = vpop.f32.mrb[4].mxu1 }
 0x435   : > { %v1369_v51 = vadd.f32 %v2514_v49, %v1368_v50  ;;  %v2623_v52 = vpop.f32.mrb[5].mxu1 }
 0x436   : > { %v1371_v53 = vpop.f32.mrb[6].mxu1 }
 0x437   : > { %v2624_v54 = vpop.f32.mrb[7].mxu1  ;;  %v1374_v55 = vsel %vm1327_vm3, %v1369_v51, -inf }
 0x438   : > { %1375 = vmax.xlane.f32.xlu0 %v1374_v55 }
 0x4a6   : > { %v1479_v0 = vpop.f32.mrb[8].mxu1 }
 0x4a7   : > { %v1480_v1 = vadd.f32 %v2514_v49, %v1479_v0  ;;  %v2635_v2 = vpop.f32.mrb[9].mxu1 }
 0x4a8   : > { %v1482_v3 = vpop.f32.mrb[10].mxu1  ;;  %v2866_v2 = vld [vmem:[%s3786_s17] sm:$0xff]  }
 0x4a9   : > { %v2636_v4 = vpop.f32.mrb[11].mxu1  ;;  %v1485_v5 = vsel %vm1327_vm3, %v1480_v1, -inf  ;;  %2668 = vmatpush3.bf16.msra.mxu1 %v2866_v2 }
 0x4aa   : > { %1486 = vmax.xlane.f32.xlu1 %v1485_v5  ;;  %2669 = vmatprep.subr.bf16.mxu1 %v3251_v17 }
 0x4ae   : > { %v1590_v6 = vpop.f32.mrb[12].mxu1 }
 0x4af   : > { %v1591_v7 = vadd.f32 %v2514_v49, %v1590_v6  ;;  %v2647_v8 = vpop.f32.mrb[13].mxu1 }
 0x4b0   : > { %v1593_v9 = vpop.f32.mrb[14].mxu1 }
 0x4b1   : > { %v2648_v10 = vpop.f32.mrb[15].mxu1  ;;  %v1596_v11 = vsel %vm1327_vm3, %v1591_v7, -inf }
 0x4b2   : > { %1597 = vmax.xlane.f32.xlu0 %v1596_v11 }
 0x4b6   : > { %v1700_v12 = vpop.f32.mrb[16].mxu1 }
 0x4b7   : > { %v1701_v13 = vadd.f32 %v2514_v49, %v1700_v12  ;;  %v2659_v14 = vpop.f32.mrb[17].mxu1 }
 0x4b8   : > { %v1703_v15 = vpop.f32.mrb[18].mxu1 }
 0x4b9   : > { %v2660_v16 = vpop.f32.mrb[19].mxu1  ;;  %v1706_v18 = vsel %vm1327_vm3, %v1701_v13, -inf }
 0x4ba   : > { %1707 = vmax.xlane.f32.xlu0 %v1706_v18 }
 0x4c5   : > { %v1376_v19 = vpop.xlane.xlu0 %1375 }
 0x4c6   : > { %v1377_v21 = vsub.f32 %v1369_v51, %v1376_v19 }
 0x4c8   : > { %v1378_v22 = vmul.f32 1.442695, %v1377_v21 }
 0x4ca   : > { %2874 = vpow2.f32 %v1378_v22 }
 0x4d4   : > { %v2875_v23 = vpop.eup %2874 }
 0x4d5   : > { %v1380_v24 = vsel %vm1327_vm3, %v2875_v23, 0.0 }
 0x4d6   : > { %1381 = vadd.xlane.f32.xlu1 %v1380_v24 }
 0x4e7   : > { %1498 = vrot.lane.b32.xlu1 %v1320_v61, %s3254_s8 }
 0x537   : > { %v1487_v25 = vpop.xlane.xlu1 %1486 }
 0x538   : > { %v1488_v26 = vsub.f32 %v1480_v1, %v1487_v25  ;;  %v2523_v25 = vld [vmem:[%s4295_s22] ss:$0 sm:$0xff] }
 0x53a   : > { %v1489_v27 = vmul.f32 1.442695, %v1488_v26 }
 0x53c   : > { %2876 = vpow2.f32 %v1489_v27 }
 0x53f   : > { %v1598_v28 = vpop.xlane.xlu0 %1597 }
 0x540   : > { %v1599_v29 = vsub.f32 %v1591_v7, %v1598_v28  ;;  %v2867_v7 = vld [vmem:[%s3786_s17 + $0x8] sm:$0xff]  }
 0x541   : > { %2670 = vmatpush3.bf16.msra.mxu1 %v2867_v7 }
 0x542   : > { %v1600_v30 = vmul.f32 1.442695, %v1599_v29  ;;  %2683 = vmatprep.subr.bf16.mxu1 %v3251_v17 }
 0x544   : > { %2878 = vpow2.f32 %v1600_v30 }
 0x546   : > { %v2877_v31 = vpop.eup %2876 }
 0x547   : > { %v1708_v32 = vpop.xlane.xlu0 %1707  ;;  %v1491_v33 = vsel %vm1327_vm3, %v2877_v31, 0.0 }
 0x548   : > { %v1709_v34 = vsub.f32 %v1701_v13, %v1708_v32  ;;  %1492 = vadd.xlane.f32.xlu0 %v1491_v33 }
 0x54a   : > { %v1710_v35 = vmul.f32 1.442695, %v1709_v34 }
 0x54c   : > { %2880 = vpow2.f32 %v1710_v35 }
 0x54e   : > { %v2879_v36 = vpop.eup %2878 }
 0x54f   : > { %v1602_v37 = vsel %vm1327_vm3, %v2879_v36, 0.0 }
 0x550   : > { %1603 = vadd.xlane.f32.xlu1 %v1602_v37 }
 0x556   : > { %v2881_v38 = vpop.eup %2880 }
 0x557   : > { %v1712_v39 = vsel %vm1327_vm3, %v2881_v38, 0.0 }
 0x558   : > { %1713 = vadd.xlane.f32.xlu0 %v1712_v39  ;;  %v2869_v39 = vld [vmem:[%s4296_s21 + $0x8] sm:$0xff]  }
 0x561   : > { %1718 = vrot.lane.b32.xlu1 %v1320_v61, %s3255_s16 }
 0x563   : > { %v1382_v40 = vpop.xlane.xlu1 %1381 }
 0x564   : > { %2882 = vrcp.f32 %v1382_v40 }
 0x567   : > { %v1499_v42 = vpop.permute.xlu1 %1498 }
 0x568   : > { %v1504_v45 = vsel %vm1389_vm4, %v1499_v42, 0 }
 0x56e   : > { %v2883_v41 = vpop.eup %2882  ;;  %1608 = vrot.lane.b32.xlu0 %v1320_v61, %s3253_s10  ;;  %s4297_s10 = sld [smem:[#allocation52_spill]] }
 0x56f   : > { %v1384_v43 = vmul.f32 %v2883_v41, %v2875_v23 }
 0x571   : > { %v1385_v44 = vpack.c.bf16 %v1384_v43, %v1384_v43 }
 0x573   : > { %2628 = vmatmul.mubr.msk.bf16.vlgmr.msra.gmra.mrb[8].mxu0 %vm1327_vm3, %v1385_v44 }
 0x574   : > { %2638 = vmatpush3.bf16.msra.mxu0 %v1504_v45  ;;  %2639 = vmatprep.mubr.msk.bf16.mxu0 %vm3252_vm1, %v3251_v17  ;;  %s4298_s8 = scalar_lea.vmem %s4297_s10, %s3800_s14  ;;  %v2528_v45 = vld [vmem:[%s1069_s11] ss:$0 sm:$0xff] }
 0x575   : > { %2649 = vmatprep.subr.bf16.mxu0 %v3251_v17  ;;  %v2527_v43 = vld [vmem:[%s4298_s8] ss:$0 sm:$0xff] }
 0x5d5   : > { %v1493_v46 = vpop.xlane.xlu0 %1492 }
 0x5d6   : > { %2884 = vrcp.f32 %v1493_v46 }
 0x5dd   : > { %v1604_v47 = vpop.xlane.xlu1 %1603 }
 0x5de   : > { %2886 = vrcp.f32 %v1604_v47 }
 0x5e0   : > { %v2885_v48 = vpop.eup %2884 }
 0x5e1   : > { %v1495_v49 = vmul.f32 %v2885_v48, %v2877_v31  ;;  %v1719_v56 = vpop.permute.xlu1 %1718 }
 0x5e2   : > { %v1724_v58 = vsel %vm1389_vm4, %v1719_v56, 0 }
 0x5e3   : > { %v1496_v50 = vpack.c.bf16 %v1495_v49, %v1495_v49  ;;  %v2870_v49 = vld [vmem:[%s3846_s23] sm:$0xff]  }
 0x5e5   : > { %v1714_v51 = vpop.xlane.xlu0 %1713  ;;  %2640 = vmatmul.mubr.msk.bf16.vlgmr.msra.gmra.mrb[12].mxu0 %vm1327_vm3, %v1496_v50  ;;  %v2871_v50 = vld [vmem:[%s3846_s23 + $0x8] sm:$0xff]  }
 0x5e6   : > { %2888 = vrcp.f32 %v1714_v51  ;;  %2651 = vmatprep.mubr.msk.bf16.mxu0 %vm3252_vm1, %v3251_v17  ;;  %v2872_v51 = vld [vmem:[%s3846_s23 + $0x10] sm:$0xff]  }
 0x5e8   : > { %v2887_v52 = vpop.eup %2886 }
 0x5e9   : > { %v1606_v53 = vmul.f32 %v2887_v52, %v2879_v36  ;;  %v1609_v54 = vpop.permute.xlu0 %1608  ;;  %v2873_v52 = vld [vmem:[%s3846_s23 + $0x18] sm:$0xff]  }
 0x5ea   : > { %v1614_v55 = vsel %vm1389_vm4, %v1609_v54, 0 }
 0x5eb   : > { %2650 = vmatpush3.bf16.msra.mxu0 %v1614_v55  ;;  %v1607_v57 = vpack.c.bf16 %v1606_v53, %v1606_v53  ;;  %v2529_v53 = vld [vmem:[%s911_s15] ss:$0 sm:$0xff] }
 0x5ec   : > { %2661 = vmatprep.subr.bf16.mxu0 %v3251_v17 }
 0x5ee   : > { %2652 = vmatmul.mubr.msk.bf16.vlgmr.msra.gmra.mrb[16].mxu0 %vm1327_vm3, %v1607_v57 }
 0x5ef   : > { %2662 = vmatpush3.bf16.msra.mxu0 %v1724_v58  ;;  %2663 = vmatprep.mubr.msk.bf16.mxu0 %vm3252_vm1, %v3251_v17 }
 0x5f0   : > { %v2889_v59 = vpop.eup %2888  ;;  %2675 = vmatprep.subr.bf16.mxu0 %v3251_v17 }
 0x5f1   : > { %v1716_v60 = vmul.f32 %v2889_v59, %v2881_v38  ;;  %v2868_v38 = vld [vmem:[%s4296_s21] sm:$0xff]  }
 0x5f3   : > { %v1717_v61 = vpack.c.bf16 %v1716_v60, %v1716_v60 }
 0x5f6   : > { %2664 = vmatmul.mubr.msk.bf16.vlgmr.msra.gmra.mrb[20].mxu0 %vm1327_vm3, %v1717_v61 }
 0x5f7   : > { %2679 = vmatprep.mubr.msk.bf16.mxu0 %vm3252_vm1, %v3251_v17  ;;  %2676 = vmatpush3.bf16.msra.mxu0 %v2868_v38 }
 0x5f8   : > { %2677 = vmatprep.subr.bf16.mxu0 %v3251_v17 }
 0x5fb   : > { %2678 = vmatpush3.bf16.msra.mxu0 %v2869_v39 }
 0x646   : > { %v1427_v62 = vpop.f32.mrb[8].mxu0 }
 0x647   : > { %v2629_v63 = vpop.f32.mrb[9].mxu0 }
 0x648   : > { %v1430_v0 = vpop.f32.mrb[10].mxu0 }
 0x649   : > { %v2630_v1 = vpop.f32.mrb[11].mxu0 }
 0x6b8   : > { %v1540_v3 = vpop.f32.mrb[12].mxu0 }
 0x6b9   : > { %1767 = vrot.lane.b32.xlu1 %v1540_v3, %s3256_s25  ;;  %v2641_v4 = vpop.f32.mrb[13].mxu0 }
 0x6ba   : > { %v1543_v5 = vpop.f32.mrb[14].mxu0  ;;  %v2533_v4 = vld [vmem:[%s1077_s29] ss:$0 sm:$0xff] }
 0x6bb   : > { %v2642_v6 = vpop.f32.mrb[15].mxu0 }
 0x6c1   : > { %v1650_v8 = vpop.f32.mrb[16].mxu0 }
 0x6c2   : > { %1771 = vrot.lane.b32.xlu0 %v1650_v8, %s3257_s28  ;;  %v2653_v9 = vpop.f32.mrb[17].mxu0  ;;  %s4304_s28 = sld [smem:[#allocation60_spill]] (!%p2541_p3) }
 0x6c3   : > { %v1653_v10 = vpop.f32.mrb[18].mxu0 }
 0x6c4   : > { %v2654_v11 = vpop.f32.mrb[19].mxu0 }
 0x6c9   : > { %v1760_v12 = vpop.f32.mrb[20].mxu0 }
 0x6ca   : > { %1775 = vrot.lane.b32.xlu1 %v1760_v12, %s3258_s20  ;;  %v2665_v13 = vpop.f32.mrb[21].mxu0  ;;  %s4305_s20 = smov (!%p2541_p3), %s4304_s28 }
 0x6cb   : > { %v1763_v14 = vpop.f32.mrb[22].mxu0 }
 0x6cc   : > { %v2666_v15 = vpop.f32.mrb[23].mxu0 }
 0x72b   : > { %v1768_v16 = vpop.permute.xlu1 %1767 }
 0x72c   : > { %v1778_v19 = vsel %vm1327_vm3, %v1427_v62, %v1768_v16 }
 0x734   : > { %v1772_v18 = vpop.permute.xlu0 %1771 }
 0x735   : > { %v1780_v21 = vsel %vm1779_vm5, %v1778_v19, %v1772_v18 }
 0x73c   : > { %v1776_v22 = vpop.permute.xlu1 %1775 }
 0x73d   : > { %v1782_v23 = vsel %vm1781_vm6, %v1780_v21, %v1776_v22 }
 0x73e   : > { %v1787_v24 = vpack.c.bf16 %v1782_v23, %v1782_v23  ;;  %v2539_v23 = vld [vmem:[%s1080_s19] ss:$0 sm:$0xff] }
 0x740   : > { %2672 = vmatmul.mubr.msk.bf16.vlgmr.msra.gmra.mrb[20].mxu1 %vm1148_vm2, %v1787_v24 }
 0x741   : > { %2691 = vmatprep.mubr.msk.bf16.mxu1 %vm3252_vm1, %v3251_v17  ;;  %2684 = vmatpush3.bf16.msra.mxu1 %v2870_v49 }
 0x742   : > { %2685 = vmatprep.subr.bf16.mxu1 %v3251_v17 }
 0x745   : > { %2686 = vmatpush3.bf16.msra.mxu1 %v2871_v50 }
 0x746   : > { %2687 = vmatprep.subr.bf16.mxu1 %v3251_v17 }
 0x749   : > { %2688 = vmatpush3.bf16.msra.mxu1 %v2872_v51 }
 0x74a   : > { %2689 = vmatprep.subr.bf16.mxu1 %v3251_v17 }
 0x74d   : > { %2690 = vmatpush3.bf16.msra.mxu1 %v2873_v52 }
 0x813   : > { %v1844_v26 = vpop.f32.mrb[20].mxu1 }
 0x814   : > { %v1845_v27 = vadd.f32 %v2523_v25, %v1844_v26  ;;  %v2673_v28 = vpop.f32.mrb[21].mxu1  ;;  %v2540_v25 = vld [vmem:[%s1083_s6] ss:$0 sm:$0xff] }
 0x815   : > { %v1847_v29 = vpop.f32.mrb[22].mxu1  ;;  %v2896_v28 = vld [vmem:[%s4304_s28] sm:$0xff] (!%p2541_p3)  }
 0x816   : > { %v2674_v30 = vpop.f32.mrb[23].mxu1  ;;  %v1850_v31 = vadd.f32 %v1845_v27, %v3878_v20  ;;  %v3259_v29 = vmov (!%p2541_p3), 0.0  }
 0x817   : > { %2695 = vmatprep.subr.bf16.mxu0 (!%p2541_p3), %v3259_v29  ;;  %v2897_v30 = vld [vmem:[%s4305_s20 + $0x8] sm:$0xff] (!%p2541_p3)  }
 0x818   : > { %v1853_v32 = vsel %vm1148_vm2, %v1850_v31, 0.0 }
 0x819   : > { %1854 = vadd.xlane.f32.xlu0 %v1853_v32  ;;  %v2542_v32 = vld [vmem:[%s4306_s1] ss:$0 sm:$0xff] (!%p2541_p3) }
 0x8a6   : > { %v1855_v33 = vpop.xlane.xlu0 %1854 }
 0x8a7   : > { %v1857_v34 = vmul.f32 0.03125, %v1855_v33 }
 0x8a9   : > { %v1858_v35 = vsub.f32 %v1850_v31, %v1857_v34 }
 0x8ab   : > { %v1859_v36 = vmul.f32 %v1858_v35, %v1858_v35 }
 0x8ad   : > { %v1860_v37 = vsel %vm1148_vm2, %v1859_v36, 0.0 }
 0x8ae   : > { %1861 = vadd.xlane.f32.xlu1 %v1860_v37 }
 0x93b   : > { %v1862_v20 = vpop.xlane.xlu1 %1861 }
 0x93c   : > { %v1863_v40 = vmul.f32 0.03125, %v1862_v20 }
 0x93e   : > { %v1864_v41 = vadd.f32 1e-12, %v1863_v40 }
 0x940   : > { %2890 = vrsqrt.f32 %v1864_v41 }
 0x94a   : > { %v2891_v42 = vpop.eup %2890 }
 0x94b   : > { %v1866_v44 = vmul.f32 %v2891_v42, %v1858_v35 }
 0x94d   : > { %v1873_v46 = vmul.f32 %v2527_v43, %v1866_v44 }
 0x94f   : > { %v1880_v47 = vadd.f32 %v2528_v45, %v1873_v46 }
 0x951   : > { %v1885_v48 = vpack.c.bf16 %v1880_v47, %v1880_v47 }
 0x953   : > { %2680 = vmatmul.mubr.msk.bf16.vlgmr.msra.gmra.mrb[24].mxu0 %vm1148_vm2, %v1885_v48 }
 0x954   : > { %2696 = vmatpush3.bf16.msra.mxu0 (!%p2541_p3), %v2896_v28  ;;  %2699 = vmatprep.mubr.msk.bf16.mxu0 (!%p2541_p3), %vm3260_vm8, %v3259_v29 }
 0x955   : > { %2697 = vmatprep.subr.bf16.mxu0 (!%p2541_p3), %v3259_v29 }
 0x958   : > { %2698 = vmatpush3.bf16.msra.mxu0 (!%p2541_p3), %v2897_v30 }
 0xa26   : > { %v1942_v54 = vpop.f32.mrb[24].mxu0 }
 0xa27   : > { %v1943_v55 = vadd.f32 %v2529_v53, %v1942_v54  ;;  %v2681_v56 = vpop.f32.mrb[25].mxu0 }
 0xa28   : > { %v1945_v57 = vpop.f32.mrb[26].mxu0 }
 0xa29   : > { %v1949_v58 = vmul.f32 0.044715, %v1943_v55  ;;  %v2682_v59 = vpop.f32.mrb[27].mxu0  ;;  %v1948_v1 = vmul.f32 0.5, %v1943_v55 }
 0xa2b   : > { %v1950_v60 = vmul.f32 %v1949_v58, %v1943_v55 }
 0xa2d   : > { %v1951_v61 = vmul.f32 %v1950_v60, %v1943_v55 }
 0xa2f   : > { %v1952_v62 = vadd.f32 %v1951_v61, %v1943_v55 }
 0xa31   : > { %v1953_v63 = vmul.f32 0.7978846, %v1952_v62 }
 0xa33   : > { %2892 = vtanh.f32 %v1953_v63 }
 0xa3d   : > { %v2893_v0 = vpop.eup %2892 }
 0xa3e   : > { %v1955_v2 = vadd.f32 1.0, %v2893_v0 }
 0xa40   : > { %v1956_v3 = vmul.f32 %v1955_v2, %v1948_v1 }
 0xa42   : > { %v1965_v17 = vpack.c.bf16 %v1956_v3, %v1956_v3 }
 0xa44   : > { %2692 = vmatmul.mubr.msk.bf16.vlgmr.msra.gmra.mrb[24].mxu1 %vm1997_vm7, %v1965_v17 }
 0xb17   : > { %v2035_v5 = vpop.f32.mrb[24].mxu1 }
 0xb18   : > { %v2036_v6 = vadd.f32 %v2533_v4, %v2035_v5  ;;  %v2693_v7 = vpop.f32.mrb[25].mxu1 }
 0xb19   : > { %v2038_v8 = vpop.f32.mrb[26].mxu1 }
 0xb1a   : > { %v2694_v9 = vpop.f32.mrb[27].mxu1  ;;  %v2041_v10 = vadd.f32 %v2036_v6, %v1880_v47 }
 0xb1c   : > { %v2044_v11 = vsel %vm1148_vm2, %v2041_v10, 0.0 }
 0xb1d   : > { %2045 = vadd.xlane.f32.xlu0 %v2044_v11 }
 0xbaa   : > { %v2046_v12 = vpop.xlane.xlu0 %2045 }
 0xbab   : > { %v2047_v13 = vmul.f32 0.03125, %v2046_v12 }
 0xbad   : > { %v2048_v14 = vsub.f32 %v2041_v10, %v2047_v13 }
 0xbaf   : > { %v2049_v15 = vmul.f32 %v2048_v14, %v2048_v14 }
 0xbb1   : > { %v2050_v16 = vsel %vm1148_vm2, %v2049_v15, 0.0 }
 0xbb2   : > { %2051 = vadd.xlane.f32.xlu0 %v2050_v16 }
 0xc3f   : > { %v2052_v18 = vpop.xlane.xlu0 %2051 }
 0xc40   : > { %v2053_v19 = vmul.f32 0.03125, %v2052_v18 }
 0xc42   : > { %v2054_v21 = vadd.f32 1e-12, %v2053_v19 }
 0xc44   : > { %2894 = vrsqrt.f32 %v2054_v21 }
 0xc4e   : > { %v2895_v22 = vpop.eup %2894 }
 0xc4f   : > { %v2056_v24 = vmul.f32 %v2895_v22, %v2048_v14  ;;  %2075 = sbr.rel (%p2541_p3) target bundleno = 3385 (0xd39), region = 144 }
 0xc51   : > { %v2063_v26 = vmul.f32 %v2539_v23, %v2056_v24 }
 0xc53   : > { %v2070_v27 = vadd.f32 %v2540_v25, %v2063_v26 }
 0xc55   : > { %2071 = vst.msk [vmem:[#allocation2] sm:$0xff] %vm1148_vm2, %v2070_v27  ;;  %v2080_v31 = vpack.c.bf16 (!%p2541_p3), %v2070_v27, %v2070_v27 }
 0xc57   : > { %2700 = vmatmul.mubr.msk.bf16.vlgmr.msra.gmra.mrb[0].mxu0 %vm1148_vm2, %v2080_v31 }
 0xd2a   : > { %v2137_v33 = vpop.f32.mrb[0].mxu0 }
 0xd2b   : > { %v2138_v34 = vadd.f32 %v2542_v32, %v2137_v33  ;;  %v2701_v35 = vpop.f32.mrb[1].mxu0 }
 0xd2c   : > { %v2140_v36 = vpop.f32.mrb[2].mxu0 }
 0xd2d   : > { %2898 = vtanh.f32 %v2138_v34  ;;  %v2702_v37 = vpop.f32.mrb[3].mxu0 }
 0xd37   : > { %v2899_v38 = vpop.eup %2898 }
 0xd38   : > { %2144 = vst.msk [vmem:[%s3863_s30] sm:$0xff] %vm1148_vm2, %v2899_v38 }
 0xd39 PF: > { %s4307_s26 = sld [smem:[#allocation27_spill]]  ;;  %s4308_s22 = sld [smem:[#allocation35_spill]] }
 0xd3a   : > { %s4309_s10 = sld [smem:[#allocation62_spill]]  ;;  %s2159_s16 = sshll.u32 %s3863_s30, 4  ;;  %s2160_s16 = int_to_ptr.vmem [resolvable:$true] %s2159_s16 }
 0xd3b   : > { %s2146_s27 = scalar_lea.sflag [#allocation5], %s3760_s18  ;;  %s3106_s0 = scalar_lea.vmem %s2160_s16, 128 }
 0xd3c   : > { %p3107_p1 = scmp.ne.s32.totalorder %s2160_s16, %s3106_s0  ;;  %s3261_s11 = smov [#allocation15]  }
 0xd3d   : > { %s3110_s5 = sshll.u32 %s3261_s11, 4  ;;  %s3111_s5 = int_to_ptr.vmem [resolvable:$false] %s3110_s5 }
 0xd3e   : > { %s3112_s23 = scalar_lea.vmem %s3111_s5, 256  ;;  %p3113_p10 = scmp.lt.s32.totalorder %s2160_s16, %s3111_s5 }
 0xd3f   : > { %s2547_s21 = sshll.u32 %s4307_s26, 7  ;;  %p4310_p8 = scmp.ne.s32.totalorder %s4308_s22, 0 }
 0xd40   : > { %s4049_s8 = scalar_lea.hbm %s4309_s10, %s2547_s21  ;;  %p3114_p11 = scmp.lt.s32.totalorder %s3112_s23, %s3106_s0 }
 0xd41   : > { %p3108_p13 = pnand %p3107_p1, %p4310_p8 }
 0xd42   : > { %p3115_p6 = por %p3114_p11, %p3113_p10 }
 0xd43   : > { %p3109_p0 = pneg %p3108_p13 }
 0xd45   : > { %p3116_p7 = pnand %p3115_p6, %p3109_p0 }
 0xd47   : > { %3119 = shalt.err (!%p3116_p7)
}
 0xd48   : > { %s3120_s18 = scalar_lea.hbm %s4049_s8, 128  ;;  %s3124_s15 = scalar_lea.hbm %s4309_s10, 256 }
 0xd49   : > { %p3121_p5 = scmp.ne.s32.totalorder %s4049_s8, %s3120_s18  ;;  %p3125_p9 = scmp.lt.u32.totalorder %s4049_s8, %s4309_s10 }
 0xd4a   : > { %p3126_p2 = scmp.lt.u32.totalorder %s3124_s15, %s3120_s18  ;;  %p3128_p1 = scmp.lt.u32.totalorder %s3120_s18, %s4049_s8 }
 0xd4b   : > { %p3122_p12 = pnand %p3121_p5, %p4310_p8 }
 0xd4c   : > { %p3127_p3 = por %p3126_p2, %p3125_p9 }
 0xd4d   : > { %p3123_p4 = pneg %p3122_p12 }
 0xd4e   : > { %p3129_p13 = por %p3128_p1, %p3127_p3 }
 0xd50   : > { %p3130_p0 = pnand %p3129_p13, %p3123_p4 }
 0xd52   : > { %3133 = shalt.err (!%p3130_p0)
}
 0xd53   : > { %2721 = dma.vmem_to_hbm [thread:$0]  (%p4310_p8), %s2160_s16, 128, %s4049_s8, %s2146_s27  }
 0xd54 PF: > { %s4311_s13 = sld [smem:[#allocation30_spill]]  ;;  %s4312_s7 = sld [smem:[#allocation23_spill]] }
 0xd55   : > { %s4313_s9 = sld [smem:[#allocation37_spill]] }
 0xd5a   : > { %p2755_p10 = scmp.ge.s32.totalorder %s4311_s13, 2  ;;  %s2171_s2 = sand.u32 1, %s4312_s7  }
 0xd5b   : > { %p4314_p11 = scmp.ne.s32.totalorder %s4313_s9, 0  ;;  %s2172_s25 = scalar_lea.sflag [#allocation5], %s2171_s2 }
 0xd5d   : > { %p2747_p6 = pnand %p2755_p10, %p4314_p11 }
 0xd5f   : > { %3195 = dma.done.wait (!%p2747_p6), %s2172_s25, 128  }
 0xd60   : > { %3197 = vsyncadd (!%p2747_p6), %s2172_s25, 4294967168  ;;  %s45_s6 = sadd.s32 1, %s4311_s13   ;;  %s4315_s3 = sld [smem:[#allocation21_spill]] }
 0xd61   : > { %p42_p7 = scmp.ge.s32.totalorder %s45_s6, 6   ;;  %s4316_s28 = sld [smem:[#allocation22_spill]] }
 0xd62   : > { %s4317_s29 = sld [smem:[#allocation34_spill]]  ;;  %s4318_s30 = sld [smem:[#allocation24_spill]] }
 0xd63   : > { %s4319_s4 = sld [smem:[#allocation25_spill]]  ;;  %s4320_s0 = sld [smem:[#allocation38_spill]] }
 0xd64   : > { %s4321_s23 = sld [smem:[#allocation28_spill]]  ;;  %s4322_s1 = sld [smem:[#allocation29_spill]] }
 0xd65   : > { %s4323_s5 = sld [smem:[#allocation33_spill]]  ;;  %s4324_s24 = sld [smem:[#allocation36_spill]] }
 0xd66   :  { %44 = sbr.rel (!%p42_p7) target bundleno = 38 (0x26), region = 256 }
 0xd6d   :  { %2177 = vsyncpa [#allocation4], 1 }
 0xd6e   :  { %2179 = vsyncpa [#allocation4 + $0x1], 1 }
 0xd6f   :  { %2180 = vsyncpa [#allocation7], 1 }
 0xd70   :  { %2181 = vsyncpa [#allocation10], 1 }
 0xd71   :  { %2183 = vsyncpa [#allocation10 + $0x1], 1 }
 0xd72   :  { %2184 = vsyncpa [#allocation13], 1 }
 0xd73   :  { %2186 = vsyncpa [#allocation13 + $0x1], 1 }
 0xd74   :  { %2187 = vsyncpa [#allocation5], 1 }
 0xd75   :  { %2189 = vsyncpa [#allocation5 + $0x1], 1 }

</bundles_post_ra>
